<compile_context>
chip_gen: v7x
topology: tpu7x:2x2x1
jax: 0.10.0
libtpu: 0.0.40
codegen_flags: <defaults>
</compile_context>

<pallas_src>
import functools

import jax
import jax.numpy as jnp
from jax.experimental import pallas as pl
from jax.experimental.pallas import tpu as pltpu

EPS = 0.001
LANE = 128


def _depth_wrapper_kernel(x_ref, lr_ref, stats_ref, w1_ref, w1d_ref, b1_ref,
                          w2_ref, b2_ref, out_ref, *, n_chan, n_hidden):
    """One grid step == one (batch, spatial-tile) pair.

    x_ref:  (C, TR, 128) VMEM   lane-dense RGB tile
    lr_ref: (TR, 128)    VMEM   lane-dense low-res depth tile
    stats_ref: (B, 3)    SMEM   per-batch [dmin, scale, 1/scale]
    w1_ref: (C, HID)     SMEM   layer-1 weights with 1/std folded in
    w1d_ref/b1_ref/w2_ref: (HID,) SMEM   depth branch / bias / layer-2 weights
    b2_ref: (1,)         SMEM
    out_ref: (TR, 128)   VMEM
    """
    b = pl.program_id(0)
    dmin = stats_ref[b, 0]
    scale = stats_ref[b, 1]
    inv_scale = stats_ref[b, 2]

    xs = [x_ref[c] for c in range(n_chan)]     # each (TR, 128)
    lr = lr_ref[...]                           # (TR, 128)

    # Unrolled VPU FMA loop over hidden channels (no MXU: K=3 / N=1 shapes are
    # pathological for the systolic array).  Per-batch warp/unwarp scalars are
    # folded into per-hidden scalar coefficients (scalar ALU, effectively free).
    acc = None
    for k in range(n_hidden):
        ad = w1d_ref[k] * inv_scale
        bk = b1_ref[k] - dmin * inv_scale * w1d_ref[k]
        hk = lr * ad + bk
        for c in range(n_chan):
            hk = hk + xs[c] * w1_ref[c, k]
        hk = jnp.maximum(hk, 0.0)
        term = hk * (w2_ref[k] * scale)        # unwarp scale folded into w2
        acc = term if acc is None else acc + term

    # unwarp shift: d*scale + dmin  ==  acc + (b2*scale + dmin)
    out_ref[...] = acc + (b2_ref[0] * scale + dmin)


def depth_model_wrapper_forward(x, lowres_depth, msks, params,
                                absolute=True, align_scale=False,
                                tile_rows=32):
    """x: (B, 3, H, W) NCHW float32; lowres_depth: (B, H, W); msks: (B, H, W)."""
    del msks  # only used by the align_scale (RANSAC) branch, see TODO below
    B, C, H, W = x.shape
    HW = H * W
    HID = params["w1x"].shape[1]

    # ---- hoisted per-batch WarpMinMax statistics (memory-bound, nearly free) ----
    lr2d = lowres_depth.reshape(B, HW).astype(jnp.float32)
    dmin = jnp.min(lr2d, axis=1)
    dmax = jnp.max(lr2d, axis=1)
    dmax = jnp.where(dmax - dmin < EPS, dmin + EPS, dmax)     # EPS clamp
    scale = dmax - dmin
    stats = jnp.stack([dmin, scale, 1.0 / scale], axis=1)     # (B, 3) -> SMEM

    # ---- fold (x - mean) / std into the first-layer weights (offline, f32) ----
    mean = params["mean"].reshape(C).astype(jnp.float32)
    std = params["std"].reshape(C).astype(jnp.float32)
    w1x = params["w1x"].astype(jnp.float32)                   # (C, HID)
    w1_eff = w1x / std[:, None]                               # (C, HID)
    b1_eff = params["b1"].reshape(HID).astype(jnp.float32) - (mean / std) @ w1x
    w1d = params["w1d"].reshape(HID).astype(jnp.float32)
    w2 = params["w2"].reshape(HID).astype(jnp.float32)
    b2 = params["b2"].reshape(1).astype(jnp.float32)

    # ---- lane-dense layout + spatial tiling ----
    rows0 = -(-HW // LANE)                        # ceil(HW / 128)
    TR = tile_rows if rows0 >= tile_rows else rows0
    rows = -(-rows0 // TR) * TR                   # pad rows to a multiple of TR
    pad = rows * LANE - HW

    x_l = x.reshape(B, C, HW).astype(jnp.float32)
    lr_l = lr2d
    if pad:
        x_l = jnp.pad(x_l, ((0, 0), (0, 0), (0, pad)))
        lr_l = jnp.pad(lr_l, ((0, 0), (0, pad)))
    x_l = x_l.reshape(B, C, rows, LANE)
    lr_l = lr_l.reshape(B, rows, LANE)
    num_tiles = rows // TR

    kernel = functools.partial(_depth_wrapper_kernel, n_chan=C, n_hidden=HID)
    smem_spec = pl.BlockSpec(memory_space=pltpu.MemorySpace.SMEM)

    out = pl.pallas_call(
        kernel,
        out_shape=jax.ShapeDtypeStruct((B, rows, LANE), jnp.float32),
        grid=(B, num_tiles),
        in_specs=[
            pl.BlockSpec((pl.Squeezed(), C, TR, LANE), lambda b, t: (b, 0, t, 0)),  # x
            pl.BlockSpec((pl.Squeezed(), TR, LANE), lambda b, t: (b, t, 0)),        # lowres
            smem_spec,   # stats (B, 3)
            smem_spec,   # w1_eff (C, HID)
            smem_spec,   # w1d (HID,)
            smem_spec,   # b1_eff (HID,)
            smem_spec,   # w2 (HID,)
            smem_spec,   # b2 (1,)
        ],
        out_specs=pl.BlockSpec((pl.Squeezed(), TR, LANE), lambda b, t: (b, t, 0)),
        compiler_params=pltpu.CompilerParams(
            dimension_semantics=("parallel", "parallel"),
            vmem_limit_bytes=32 * 1024 * 1024),
    )(x_l, lr_l, stats, w1_eff, w1d, b1_eff, w2, b2)

    depth = out.reshape(B, rows * LANE)[:, :HW].reshape(B, H, W)

    if align_scale:
        # TODO(synk): recover_metric_depth_ransac (per-sample host-side RANSAC
        # scale/shift fit against lowres_depth under msks) has data-dependent
        # iteration; no clean Pallas equivalent.
        pass
    if not absolute:
        # The absolute=False branch re-warps depth against itself; not exercised.
        pass
    return depth


def depth_model_wrapper_reference(x, lowres_depth, params):
    """Pure-JAX reference of the same dataflow (for correctness checking)."""
    B, C, H, W = x.shape
    HW = H * W
    mean = params["mean"].reshape(1, C, 1, 1)
    std = params["std"].reshape(1, C, 1, 1)
    lr = lowres_depth.reshape(B, HW)
    dmin = lr.min(axis=1)
    dmax = lr.max(axis=1)
    dmax = jnp.where(dmax - dmin < EPS, dmin + EPS, dmax)
    scale = dmax - dmin
    warped = (lowres_depth - dmin[:, None, None]) / scale[:, None, None]
    xn = (x - mean) / std
    xn_f = xn.transpose(0, 2, 3, 1).reshape(B, HW, C)
    w_f = warped.reshape(B, HW, 1)
    h = xn_f @ params["w1x"] + w_f * params["w1d"].reshape(1, 1, -1) \
        + params["b1"].reshape(1, 1, -1)
    h = jnp.maximum(h, 0.0)
    d = h @ params["w2"].reshape(-1, 1) + params["b2"].reshape(1, 1, 1)
    d = d.reshape(B, H, W)
    return d * scale[:, None, None] + dmin[:, None, None]


def make_params(key, c_in=3, hidden=32):
    ks = jax.random.split(key, 6)
    return {
        "mean": jnp.array([[0.485, 0.456, 0.406]], dtype=jnp.float32),
        "std": jnp.array([[0.229, 0.224, 0.225]], dtype=jnp.float32),
        "w1x": 0.1 * jax.random.normal(ks[0], (c_in, hidden), jnp.float32),
        "w1d": 0.1 * jax.random.normal(ks[1], (1, hidden), jnp.float32),
        "b1": 0.01 * jax.random.normal(ks[2], (1, hidden), jnp.float32),
        "w2": 0.1 * jax.random.normal(ks[3], (hidden, 1), jnp.float32),
        "b2": 0.01 * jax.random.normal(ks[4], (1, 1), jnp.float32),
    }


if __name__ == "__main__":
    key = jax.random.PRNGKey(0)
    k_x, k_d, k_p = jax.random.split(key, 3)

    B, C, H, W = 2, 3, 16, 16
    HID = 32

    x = jax.random.uniform(k_x, (B, C, H, W), jnp.float32)
    lowres_depth = 0.5 + 5.0 * jax.random.uniform(k_d, (B, H, W), jnp.float32)
    msks = jnp.ones((B, H, W), dtype=jnp.bool_)   # unused (align_scale=False)
    params = make_params(k_p, c_in=C, hidden=HID)

    depth = depth_model_wrapper_forward(x, lowres_depth, msks, params,
                                        absolute=True, align_scale=False)
    depth = jax.block_until_ready(depth)

    assert depth.shape == (B, H, W) and depth.dtype == jnp.float32
    assert bool(jnp.all(jnp.isfinite(depth)))

    ref = depth_model_wrapper_reference(x, lowres_depth, params)
    ref = jax.block_until_ready(ref)
    assert bool(jnp.allclose(depth, ref, rtol=1e-3, atol=1e-3)), \
        f"max abs err {float(jnp.max(jnp.abs(depth - ref)))}"

    print("KERNEL_OK")
</pallas_src>

<mosaic_0001>
module attributes {stable_mosaic.version = 11 : i64} {
  func.func @_depth_wrapper_kernel(%arg0: i32, %arg1: i32, %arg2: memref<1x3x2x128xf32, #tpu.memory_space<vmem>>, %arg3: memref<1x2x128xf32, #tpu.memory_space<vmem>>, %arg4: memref<2x3xf32, #tpu.memory_space<smem>>, %arg5: memref<3x32xf32, #tpu.memory_space<smem>>, %arg6: memref<32xf32, #tpu.memory_space<smem>>, %arg7: memref<32xf32, #tpu.memory_space<smem>>, %arg8: memref<32xf32, #tpu.memory_space<smem>>, %arg9: memref<1xf32, #tpu.memory_space<smem>>, %arg10: memref<1x2x128xf32, #tpu.memory_space<vmem>>) attributes {dimension_semantics = [#tpu.dimension_semantics<parallel>, #tpu.dimension_semantics<parallel>], iteration_bounds = array<i64: 2, 1>, scalar_prefetch = 0 : i64, scratch_operands = 0 : i64, tpu.core_type = #tpu.core_type<tc>, window_params = [{transform_indices = @transform_0, window_bounds = array<i64: 1, 3, 2, 128>}, {transform_indices = @transform_1, window_bounds = array<i64: 1, 2, 128>}, {transform_indices = @transform_2, window_bounds = array<i64: 2, 3>}, {transform_indices = @transform_3, window_bounds = array<i64: 3, 32>}, {transform_indices = @transform_4, window_bounds = array<i64: 32>}, {transform_indices = @transform_5, window_bounds = array<i64: 32>}, {transform_indices = @transform_6, window_bounds = array<i64: 32>}, {transform_indices = @transform_7, window_bounds = array<i64: 1>}, {transform_indices = @transform_8, window_bounds = array<i64: 1, 2, 128>}]} {
    %0 = arith.index_cast %arg0 : i32 to index
    %c0 = arith.constant 0 : index
    %1 = memref.load %arg4[%0, %c0] : memref<2x3xf32, #tpu.memory_space<smem>>
    %2 = arith.index_cast %arg0 : i32 to index
    %c1 = arith.constant 1 : index
    %3 = memref.load %arg4[%2, %c1] : memref<2x3xf32, #tpu.memory_space<smem>>
    %4 = arith.index_cast %arg0 : i32 to index
    %c2 = arith.constant 2 : index
    %5 = memref.load %arg4[%4, %c2] : memref<2x3xf32, #tpu.memory_space<smem>>
    %c0_0 = arith.constant 0 : index
    %c0_1 = arith.constant 0 : index
    %c0_2 = arith.constant 0 : index
    %c0_3 = arith.constant 0 : index
    %6 = vector.load %arg2[%c0_0, %c0_1, %c0_2, %c0_3] : memref<1x3x2x128xf32, #tpu.memory_space<vmem>>, vector<1x1x2x128xf32>
    %7 = vector.shape_cast %6 : vector<1x1x2x128xf32> to vector<2x128xf32>
    %c0_4 = arith.constant 0 : index
    %c1_5 = arith.constant 1 : index
    %c0_6 = arith.constant 0 : index
    %c0_7 = arith.constant 0 : index
    %8 = vector.load %arg2[%c0_4, %c1_5, %c0_6, %c0_7] : memref<1x3x2x128xf32, #tpu.memory_space<vmem>>, vector<1x1x2x128xf32>
    %9 = vector.shape_cast %8 : vector<1x1x2x128xf32> to vector<2x128xf32>
    %c0_8 = arith.constant 0 : index
    %c2_9 = arith.constant 2 : index
    %c0_10 = arith.constant 0 : index
    %c0_11 = arith.constant 0 : index
    %10 = vector.load %arg2[%c0_8, %c2_9, %c0_10, %c0_11] : memref<1x3x2x128xf32, #tpu.memory_space<vmem>>, vector<1x1x2x128xf32>
    %11 = vector.shape_cast %10 : vector<1x1x2x128xf32> to vector<2x128xf32>
    %c0_12 = arith.constant 0 : index
    %c0_13 = arith.constant 0 : index
    %c0_14 = arith.constant 0 : index
    %12 = vector.load %arg3[%c0_12, %c0_13, %c0_14] : memref<1x2x128xf32, #tpu.memory_space<vmem>>, vector<1x2x128xf32>
    %13 = vector.shape_cast %12 : vector<1x2x128xf32> to vector<2x128xf32>
    %c0_15 = arith.constant 0 : index
    %14 = memref.load %arg6[%c0_15] : memref<32xf32, #tpu.memory_space<smem>>
    %15 = arith.mulf %14, %5 : f32
    %c0_16 = arith.constant 0 : index
    %16 = memref.load %arg7[%c0_16] : memref<32xf32, #tpu.memory_space<smem>>
    %17 = arith.mulf %1, %5 : f32
    %c0_17 = arith.constant 0 : index
    %18 = memref.load %arg6[%c0_17] : memref<32xf32, #tpu.memory_space<smem>>
    %19 = arith.mulf %17, %18 : f32
    %20 = arith.subf %16, %19 : f32
    %21 = vector.broadcast %15 : f32 to vector<2x128xf32>
    %22 = arith.mulf %13, %21 : vector<2x128xf32>
    %23 = vector.broadcast %20 : f32 to vector<2x128xf32>
    %24 = arith.addf %22, %23 : vector<2x128xf32>
    %c0_18 = arith.constant 0 : index
    %c0_19 = arith.constant 0 : index
    %25 = memref.load %arg5[%c0_18, %c0_19] : memref<3x32xf32, #tpu.memory_space<smem>>
    %26 = vector.broadcast %25 : f32 to vector<2x128xf32>
    %27 = arith.mulf %7, %26 : vector<2x128xf32>
    %28 = arith.addf %24, %27 : vector<2x128xf32>
    %c1_20 = arith.constant 1 : index
    %c0_21 = arith.constant 0 : index
    %29 = memref.load %arg5[%c1_20, %c0_21] : memref<3x32xf32, #tpu.memory_space<smem>>
    %30 = vector.broadcast %29 : f32 to vector<2x128xf32>
    %31 = arith.mulf %9, %30 : vector<2x128xf32>
    %32 = arith.addf %28, %31 : vector<2x128xf32>
    %c2_22 = arith.constant 2 : index
    %c0_23 = arith.constant 0 : index
    %33 = memref.load %arg5[%c2_22, %c0_23] : memref<3x32xf32, #tpu.memory_space<smem>>
    %34 = vector.broadcast %33 : f32 to vector<2x128xf32>
    %35 = arith.mulf %11, %34 : vector<2x128xf32>
    %36 = arith.addf %32, %35 : vector<2x128xf32>
    %cst = arith.constant 0.000000e+00 : f32
    %37 = vector.broadcast %cst : f32 to vector<2x128xf32>
    %38 = arith.maximumf %36, %37 : vector<2x128xf32>
    %c0_24 = arith.constant 0 : index
    %39 = memref.load %arg8[%c0_24] : memref<32xf32, #tpu.memory_space<smem>>
    %40 = arith.mulf %39, %3 : f32
    %41 = vector.broadcast %40 : f32 to vector<2x128xf32>
    %42 = arith.mulf %38, %41 : vector<2x128xf32>
    %c1_25 = arith.constant 1 : index
    %43 = memref.load %arg6[%c1_25] : memref<32xf32, #tpu.memory_space<smem>>
    %44 = arith.mulf %43, %5 : f32
    %c1_26 = arith.constant 1 : index
    %45 = memref.load %arg7[%c1_26] : memref<32xf32, #tpu.memory_space<smem>>
    %46 = arith.mulf %1, %5 : f32
    %c1_27 = arith.constant 1 : index
    %47 = memref.load %arg6[%c1_27] : memref<32xf32, #tpu.memory_space<smem>>
    %48 = arith.mulf %46, %47 : f32
    %49 = arith.subf %45, %48 : f32
    %50 = vector.broadcast %44 : f32 to vector<2x128xf32>
    %51 = arith.mulf %13, %50 : vector<2x128xf32>
    %52 = vector.broadcast %49 : f32 to vector<2x128xf32>
    %53 = arith.addf %51, %52 : vector<2x128xf32>
    %c0_28 = arith.constant 0 : index
    %c1_29 = arith.constant 1 : index
    %54 = memref.load %arg5[%c0_28, %c1_29] : memref<3x32xf32, #tpu.memory_space<smem>>
    %55 = vector.broadcast %54 : f32 to vector<2x128xf32>
    %56 = arith.mulf %7, %55 : vector<2x128xf32>
    %57 = arith.addf %53, %56 : vector<2x128xf32>
    %c1_30 = arith.constant 1 : index
    %c1_31 = arith.constant 1 : index
    %58 = memref.load %arg5[%c1_30, %c1_31] : memref<3x32xf32, #tpu.memory_space<smem>>
    %59 = vector.broadcast %58 : f32 to vector<2x128xf32>
    %60 = arith.mulf %9, %59 : vector<2x128xf32>
    %61 = arith.addf %57, %60 : vector<2x128xf32>
    %c2_32 = arith.constant 2 : index
    %c1_33 = arith.constant 1 : index
    %62 = memref.load %arg5[%c2_32, %c1_33] : memref<3x32xf32, #tpu.memory_space<smem>>
    %63 = vector.broadcast %62 : f32 to vector<2x128xf32>
    %64 = arith.mulf %11, %63 : vector<2x128xf32>
    %65 = arith.addf %61, %64 : vector<2x128xf32>
    %cst_34 = arith.constant 0.000000e+00 : f32
    %66 = vector.broadcast %cst_34 : f32 to vector<2x128xf32>
    %67 = arith.maximumf %65, %66 : vector<2x128xf32>
    %c1_35 = arith.constant 1 : index
    %68 = memref.load %arg8[%c1_35] : memref<32xf32, #tpu.memory_space<smem>>
    %69 = arith.mulf %68, %3 : f32
    %70 = vector.broadcast %69 : f32 to vector<2x128xf32>
    %71 = arith.mulf %67, %70 : vector<2x128xf32>
    %72 = arith.addf %42, %71 : vector<2x128xf32>
    %c2_36 = arith.constant 2 : index
    %73 = memref.load %arg6[%c2_36] : memref<32xf32, #tpu.memory_space<smem>>
    %74 = arith.mulf %73, %5 : f32
    %c2_37 = arith.constant 2 : index
    %75 = memref.load %arg7[%c2_37] : memref<32xf32, #tpu.memory_space<smem>>
    %76 = arith.mulf %1, %5 : f32
    %c2_38 = arith.constant 2 : index
    %77 = memref.load %arg6[%c2_38] : memref<32xf32, #tpu.memory_space<smem>>
    %78 = arith.mulf %76, %77 : f32
    %79 = arith.subf %75, %78 : f32
    %80 = vector.broadcast %74 : f32 to vector<2x128xf32>
    %81 = arith.mulf %13, %80 : vector<2x128xf32>
    %82 = vector.broadcast %79 : f32 to vector<2x128xf32>
    %83 = arith.addf %81, %82 : vector<2x128xf32>
    %c0_39 = arith.constant 0 : index
    %c2_40 = arith.constant 2 : index
    %84 = memref.load %arg5[%c0_39, %c2_40] : memref<3x32xf32, #tpu.memory_space<smem>>
    %85 = vector.broadcast %84 : f32 to vector<2x128xf32>
    %86 = arith.mulf %7, %85 : vector<2x128xf32>
    %87 = arith.addf %83, %86 : vector<2x128xf32>
    %c1_41 = arith.constant 1 : index
    %c2_42 = arith.constant 2 : index
    %88 = memref.load %arg5[%c1_41, %c2_42] : memref<3x32xf32, #tpu.memory_space<smem>>
    %89 = vector.broadcast %88 : f32 to vector<2x128xf32>
    %90 = arith.mulf %9, %89 : vector<2x128xf32>
    %91 = arith.addf %87, %90 : vector<2x128xf32>
    %c2_43 = arith.constant 2 : index
    %c2_44 = arith.constant 2 : index
    %92 = memref.load %arg5[%c2_43, %c2_44] : memref<3x32xf32, #tpu.memory_space<smem>>
    %93 = vector.broadcast %92 : f32 to vector<2x128xf32>
    %94 = arith.mulf %11, %93 : vector<2x128xf32>
    %95 = arith.addf %91, %94 : vector<2x128xf32>
    %cst_45 = arith.constant 0.000000e+00 : f32
    %96 = vector.broadcast %cst_45 : f32 to vector<2x128xf32>
    %97 = arith.maximumf %95, %96 : vector<2x128xf32>
    %c2_46 = arith.constant 2 : index
    %98 = memref.load %arg8[%c2_46] : memref<32xf32, #tpu.memory_space<smem>>
    %99 = arith.mulf %98, %3 : f32
    %100 = vector.broadcast %99 : f32 to vector<2x128xf32>
    %101 = arith.mulf %97, %100 : vector<2x128xf32>
    %102 = arith.addf %72, %101 : vector<2x128xf32>
    %c3 = arith.constant 3 : index
    %103 = memref.load %arg6[%c3] : memref<32xf32, #tpu.memory_space<smem>>
    %104 = arith.mulf %103, %5 : f32
    %c3_47 = arith.constant 3 : index
    %105 = memref.load %arg7[%c3_47] : memref<32xf32, #tpu.memory_space<smem>>
    %106 = arith.mulf %1, %5 : f32
    %c3_48 = arith.constant 3 : index
    %107 = memref.load %arg6[%c3_48] : memref<32xf32, #tpu.memory_space<smem>>
    %108 = arith.mulf %106, %107 : f32
    %109 = arith.subf %105, %108 : f32
    %110 = vector.broadcast %104 : f32 to vector<2x128xf32>
    %111 = arith.mulf %13, %110 : vector<2x128xf32>
    %112 = vector.broadcast %109 : f32 to vector<2x128xf32>
    %113 = arith.addf %111, %112 : vector<2x128xf32>
    %c0_49 = arith.constant 0 : index
    %c3_50 = arith.constant 3 : index
    %114 = memref.load %arg5[%c0_49, %c3_50] : memref<3x32xf32, #tpu.memory_space<smem>>
    %115 = vector.broadcast %114 : f32 to vector<2x128xf32>
    %116 = arith.mulf %7, %115 : vector<2x128xf32>
    %117 = arith.addf %113, %116 : vector<2x128xf32>
    %c1_51 = arith.constant 1 : index
    %c3_52 = arith.constant 3 : index
    %118 = memref.load %arg5[%c1_51, %c3_52] : memref<3x32xf32, #tpu.memory_space<smem>>
    %119 = vector.broadcast %118 : f32 to vector<2x128xf32>
    %120 = arith.mulf %9, %119 : vector<2x128xf32>
    %121 = arith.addf %117, %120 : vector<2x128xf32>
    %c2_53 = arith.constant 2 : index
    %c3_54 = arith.constant 3 : index
    %122 = memref.load %arg5[%c2_53, %c3_54] : memref<3x32xf32, #tpu.memory_space<smem>>
    %123 = vector.broadcast %122 : f32 to vector<2x128xf32>
    %124 = arith.mulf %11, %123 : vector<2x128xf32>
    %125 = arith.addf %121, %124 : vector<2x128xf32>
    %cst_55 = arith.constant 0.000000e+00 : f32
    %126 = vector.broadcast %cst_55 : f32 to vector<2x128xf32>
    %127 = arith.maximumf %125, %126 : vector<2x128xf32>
    %c3_56 = arith.constant 3 : index
    %128 = memref.load %arg8[%c3_56] : memref<32xf32, #tpu.memory_space<smem>>
    %129 = arith.mulf %128, %3 : f32
    %130 = vector.broadcast %129 : f32 to vector<2x128xf32>
    %131 = arith.mulf %127, %130 : vector<2x128xf32>
    %132 = arith.addf %102, %131 : vector<2x128xf32>
    %c4 = arith.constant 4 : index
    %133 = memref.load %arg6[%c4] : memref<32xf32, #tpu.memory_space<smem>>
    %134 = arith.mulf %133, %5 : f32
    %c4_57 = arith.constant 4 : index
    %135 = memref.load %arg7[%c4_57] : memref<32xf32, #tpu.memory_space<smem>>
    %136 = arith.mulf %1, %5 : f32
    %c4_58 = arith.constant 4 : index
    %137 = memref.load %arg6[%c4_58] : memref<32xf32, #tpu.memory_space<smem>>
    %138 = arith.mulf %136, %137 : f32
    %139 = arith.subf %135, %138 : f32
    %140 = vector.broadcast %134 : f32 to vector<2x128xf32>
    %141 = arith.mulf %13, %140 : vector<2x128xf32>
    %142 = vector.broadcast %139 : f32 to vector<2x128xf32>
    %143 = arith.addf %141, %142 : vector<2x128xf32>
    %c0_59 = arith.constant 0 : index
    %c4_60 = arith.constant 4 : index
    %144 = memref.load %arg5[%c0_59, %c4_60] : memref<3x32xf32, #tpu.memory_space<smem>>
    %145 = vector.broadcast %144 : f32 to vector<2x128xf32>
    %146 = arith.mulf %7, %145 : vector<2x128xf32>
    %147 = arith.addf %143, %146 : vector<2x128xf32>
    %c1_61 = arith.constant 1 : index
    %c4_62 = arith.constant 4 : index
    %148 = memref.load %arg5[%c1_61, %c4_62] : memref<3x32xf32, #tpu.memory_space<smem>>
    %149 = vector.broadcast %148 : f32 to vector<2x128xf32>
    %150 = arith.mulf %9, %149 : vector<2x128xf32>
    %151 = arith.addf %147, %150 : vector<2x128xf32>
    %c2_63 = arith.constant 2 : index
    %c4_64 = arith.constant 4 : index
    %152 = memref.load %arg5[%c2_63, %c4_64] : memref<3x32xf32, #tpu.memory_space<smem>>
    %153 = vector.broadcast %152 : f32 to vector<2x128xf32>
    %154 = arith.mulf %11, %153 : vector<2x128xf32>
    %155 = arith.addf %151, %154 : vector<2x128xf32>
    %cst_65 = arith.constant 0.000000e+00 : f32
    %156 = vector.broadcast %cst_65 : f32 to vector<2x128xf32>
    %157 = arith.maximumf %155, %156 : vector<2x128xf32>
    %c4_66 = arith.constant 4 : index
    %158 = memref.load %arg8[%c4_66] : memref<32xf32, #tpu.memory_space<smem>>
    %159 = arith.mulf %158, %3 : f32
    %160 = vector.broadcast %159 : f32 to vector<2x128xf32>
    %161 = arith.mulf %157, %160 : vector<2x128xf32>
    %162 = arith.addf %132, %161 : vector<2x128xf32>
    %c5 = arith.constant 5 : index
    %163 = memref.load %arg6[%c5] : memref<32xf32, #tpu.memory_space<smem>>
    %164 = arith.mulf %163, %5 : f32
    %c5_67 = arith.constant 5 : index
    %165 = memref.load %arg7[%c5_67] : memref<32xf32, #tpu.memory_space<smem>>
    %166 = arith.mulf %1, %5 : f32
    %c5_68 = arith.constant 5 : index
    %167 = memref.load %arg6[%c5_68] : memref<32xf32, #tpu.memory_space<smem>>
    %168 = arith.mulf %166, %167 : f32
    %169 = arith.subf %165, %168 : f32
    %170 = vector.broadcast %164 : f32 to vector<2x128xf32>
    %171 = arith.mulf %13, %170 : vector<2x128xf32>
    %172 = vector.broadcast %169 : f32 to vector<2x128xf32>
    %173 = arith.addf %171, %172 : vector<2x128xf32>
    %c0_69 = arith.constant 0 : index
    %c5_70 = arith.constant 5 : index
    %174 = memref.load %arg5[%c0_69, %c5_70] : memref<3x32xf32, #tpu.memory_space<smem>>
    %175 = vector.broadcast %174 : f32 to vector<2x128xf32>
    %176 = arith.mulf %7, %175 : vector<2x128xf32>
    %177 = arith.addf %173, %176 : vector<2x128xf32>
    %c1_71 = arith.constant 1 : index
    %c5_72 = arith.constant 5 : index
    %178 = memref.load %arg5[%c1_71, %c5_72] : memref<3x32xf32, #tpu.memory_space<smem>>
    %179 = vector.broadcast %178 : f32 to vector<2x128xf32>
    %180 = arith.mulf %9, %179 : vector<2x128xf32>
    %181 = arith.addf %177, %180 : vector<2x128xf32>
    %c2_73 = arith.constant 2 : index
    %c5_74 = arith.constant 5 : index
    %182 = memref.load %arg5[%c2_73, %c5_74] : memref<3x32xf32, #tpu.memory_space<smem>>
    %183 = vector.broadcast %182 : f32 to vector<2x128xf32>
    %184 = arith.mulf %11, %183 : vector<2x128xf32>
    %185 = arith.addf %181, %184 : vector<2x128xf32>
    %cst_75 = arith.constant 0.000000e+00 : f32
    %186 = vector.broadcast %cst_75 : f32 to vector<2x128xf32>
    %187 = arith.maximumf %185, %186 : vector<2x128xf32>
    %c5_76 = arith.constant 5 : index
    %188 = memref.load %arg8[%c5_76] : memref<32xf32, #tpu.memory_space<smem>>
    %189 = arith.mulf %188, %3 : f32
    %190 = vector.broadcast %189 : f32 to vector<2x128xf32>
    %191 = arith.mulf %187, %190 : vector<2x128xf32>
    %192 = arith.addf %162, %191 : vector<2x128xf32>
    %c6 = arith.constant 6 : index
    %193 = memref.load %arg6[%c6] : memref<32xf32, #tpu.memory_space<smem>>
    %194 = arith.mulf %193, %5 : f32
    %c6_77 = arith.constant 6 : index
    %195 = memref.load %arg7[%c6_77] : memref<32xf32, #tpu.memory_space<smem>>
    %196 = arith.mulf %1, %5 : f32
    %c6_78 = arith.constant 6 : index
    %197 = memref.load %arg6[%c6_78] : memref<32xf32, #tpu.memory_space<smem>>
    %198 = arith.mulf %196, %197 : f32
    %199 = arith.subf %195, %198 : f32
    %200 = vector.broadcast %194 : f32 to vector<2x128xf32>
    %201 = arith.mulf %13, %200 : vector<2x128xf32>
    %202 = vector.broadcast %199 : f32 to vector<2x128xf32>
    %203 = arith.addf %201, %202 : vector<2x128xf32>
    %c0_79 = arith.constant 0 : index
    %c6_80 = arith.constant 6 : index
    %204 = memref.load %arg5[%c0_79, %c6_80] : memref<3x32xf32, #tpu.memory_space<smem>>
    %205 = vector.broadcast %204 : f32 to vector<2x128xf32>
    %206 = arith.mulf %7, %205 : vector<2x128xf32>
    %207 = arith.addf %203, %206 : vector<2x128xf32>
    %c1_81 = arith.constant 1 : index
    %c6_82 = arith.constant 6 : index
    %208 = memref.load %arg5[%c1_81, %c6_82] : memref<3x32xf32, #tpu.memory_space<smem>>
    %209 = vector.broadcast %208 : f32 to vector<2x128xf32>
    %210 = arith.mulf %9, %209 : vector<2x128xf32>
    %211 = arith.addf %207, %210 : vector<2x128xf32>
    %c2_83 = arith.constant 2 : index
    %c6_84 = arith.constant 6 : index
    %212 = memref.load %arg5[%c2_83, %c6_84] : memref<3x32xf32, #tpu.memory_space<smem>>
    %213 = vector.broadcast %212 : f32 to vector<2x128xf32>
    %214 = arith.mulf %11, %213 : vector<2x128xf32>
    %215 = arith.addf %211, %214 : vector<2x128xf32>
    %cst_85 = arith.constant 0.000000e+00 : f32
    %216 = vector.broadcast %cst_85 : f32 to vector<2x128xf32>
    %217 = arith.maximumf %215, %216 : vector<2x128xf32>
    %c6_86 = arith.constant 6 : index
    %218 = memref.load %arg8[%c6_86] : memref<32xf32, #tpu.memory_space<smem>>
    %219 = arith.mulf %218, %3 : f32
    %220 = vector.broadcast %219 : f32 to vector<2x128xf32>
    %221 = arith.mulf %217, %220 : vector<2x128xf32>
    %222 = arith.addf %192, %221 : vector<2x128xf32>
    %c7 = arith.constant 7 : index
    %223 = memref.load %arg6[%c7] : memref<32xf32, #tpu.memory_space<smem>>
    %224 = arith.mulf %223, %5 : f32
    %c7_87 = arith.constant 7 : index
    %225 = memref.load %arg7[%c7_87] : memref<32xf32, #tpu.memory_space<smem>>
    %226 = arith.mulf %1, %5 : f32
    %c7_88 = arith.constant 7 : index
    %227 = memref.load %arg6[%c7_88] : memref<32xf32, #tpu.memory_space<smem>>
    %228 = arith.mulf %226, %227 : f32
    %229 = arith.subf %225, %228 : f32
    %230 = vector.broadcast %224 : f32 to vector<2x128xf32>
    %231 = arith.mulf %13, %230 : vector<2x128xf32>
    %232 = vector.broadcast %229 : f32 to vector<2x128xf32>
    %233 = arith.addf %231, %232 : vector<2x128xf32>
    %c0_89 = arith.constant 0 : index
    %c7_90 = arith.constant 7 : index
    %234 = memref.load %arg5[%c0_89, %c7_90] : memref<3x32xf32, #tpu.memory_space<smem>>
    %235 = vector.broadcast %234 : f32 to vector<2x128xf32>
    %236 = arith.mulf %7, %235 : vector<2x128xf32>
    %237 = arith.addf %233, %236 : vector<2x128xf32>
    %c1_91 = arith.constant 1 : index
    %c7_92 = arith.constant 7 : index
    %238 = memref.load %arg5[%c1_91, %c7_92] : memref<3x32xf32, #tpu.memory_space<smem>>
    %239 = vector.broadcast %238 : f32 to vector<2x128xf32>
    %240 = arith.mulf %9, %239 : vector<2x128xf32>
    %241 = arith.addf %237, %240 : vector<2x128xf32>
    %c2_93 = arith.constant 2 : index
    %c7_94 = arith.constant 7 : index
    %242 = memref.load %arg5[%c2_93, %c7_94] : memref<3x32xf32, #tpu.memory_space<smem>>
    %243 = vector.broadcast %242 : f32 to vector<2x128xf32>
    %244 = arith.mulf %11, %243 : vector<2x128xf32>
    %245 = arith.addf %241, %244 : vector<2x128xf32>
    %cst_95 = arith.constant 0.000000e+00 : f32
    %246 = vector.broadcast %cst_95 : f32 to vector<2x128xf32>
    %247 = arith.maximumf %245, %246 : vector<2x128xf32>
    %c7_96 = arith.constant 7 : index
    %248 = memref.load %arg8[%c7_96] : memref<32xf32, #tpu.memory_space<smem>>
    %249 = arith.mulf %248, %3 : f32
    %250 = vector.broadcast %249 : f32 to vector<2x128xf32>
    %251 = arith.mulf %247, %250 : vector<2x128xf32>
    %252 = arith.addf %222, %251 : vector<2x128xf32>
    %c8 = arith.constant 8 : index
    %253 = memref.load %arg6[%c8] : memref<32xf32, #tpu.memory_space<smem>>
    %254 = arith.mulf %253, %5 : f32
    %c8_97 = arith.constant 8 : index
    %255 = memref.load %arg7[%c8_97] : memref<32xf32, #tpu.memory_space<smem>>
    %256 = arith.mulf %1, %5 : f32
    %c8_98 = arith.constant 8 : index
    %257 = memref.load %arg6[%c8_98] : memref<32xf32, #tpu.memory_space<smem>>
    %258 = arith.mulf %256, %257 : f32
    %259 = arith.subf %255, %258 : f32
    %260 = vector.broadcast %254 : f32 to vector<2x128xf32>
    %261 = arith.mulf %13, %260 : vector<2x128xf32>
    %262 = vector.broadcast %259 : f32 to vector<2x128xf32>
    %263 = arith.addf %261, %262 : vector<2x128xf32>
    %c0_99 = arith.constant 0 : index
    %c8_100 = arith.constant 8 : index
    %264 = memref.load %arg5[%c0_99, %c8_100] : memref<3x32xf32, #tpu.memory_space<smem>>
    %265 = vector.broadcast %264 : f32 to vector<2x128xf32>
    %266 = arith.mulf %7, %265 : vector<2x128xf32>
    %267 = arith.addf %263, %266 : vector<2x128xf32>
    %c1_101 = arith.constant 1 : index
    %c8_102 = arith.constant 8 : index
    %268 = memref.load %arg5[%c1_101, %c8_102] : memref<3x32xf32, #tpu.memory_space<smem>>
    %269 = vector.broadcast %268 : f32 to vector<2x128xf32>
    %270 = arith.mulf %9, %269 : vector<2x128xf32>
    %271 = arith.addf %267, %270 : vector<2x128xf32>
    %c2_103 = arith.constant 2 : index
    %c8_104 = arith.constant 8 : index
    %272 = memref.load %arg5[%c2_103, %c8_104] : memref<3x32xf32, #tpu.memory_space<smem>>
    %273 = vector.broadcast %272 : f32 to vector<2x128xf32>
    %274 = arith.mulf %11, %273 : vector<2x128xf32>
    %275 = arith.addf %271, %274 : vector<2x128xf32>
    %cst_105 = arith.constant 0.000000e+00 : f32
    %276 = vector.broadcast %cst_105 : f32 to vector<2x128xf32>
    %277 = arith.maximumf %275, %276 : vector<2x128xf32>
    %c8_106 = arith.constant 8 : index
    %278 = memref.load %arg8[%c8_106] : memref<32xf32, #tpu.memory_space<smem>>
    %279 = arith.mulf %278, %3 : f32
    %280 = vector.broadcast %279 : f32 to vector<2x128xf32>
    %281 = arith.mulf %277, %280 : vector<2x128xf32>
    %282 = arith.addf %252, %281 : vector<2x128xf32>
    %c9 = arith.constant 9 : index
    %283 = memref.load %arg6[%c9] : memref<32xf32, #tpu.memory_space<smem>>
    %284 = arith.mulf %283, %5 : f32
    %c9_107 = arith.constant 9 : index
    %285 = memref.load %arg7[%c9_107] : memref<32xf32, #tpu.memory_space<smem>>
    %286 = arith.mulf %1, %5 : f32
    %c9_108 = arith.constant 9 : index
    %287 = memref.load %arg6[%c9_108] : memref<32xf32, #tpu.memory_space<smem>>
    %288 = arith.mulf %286, %287 : f32
    %289 = arith.subf %285, %288 : f32
    %290 = vector.broadcast %284 : f32 to vector<2x128xf32>
    %291 = arith.mulf %13, %290 : vector<2x128xf32>
    %292 = vector.broadcast %289 : f32 to vector<2x128xf32>
    %293 = arith.addf %291, %292 : vector<2x128xf32>
    %c0_109 = arith.constant 0 : index
    %c9_110 = arith.constant 9 : index
    %294 = memref.load %arg5[%c0_109, %c9_110] : memref<3x32xf32, #tpu.memory_space<smem>>
    %295 = vector.broadcast %294 : f32 to vector<2x128xf32>
    %296 = arith.mulf %7, %295 : vector<2x128xf32>
    %297 = arith.addf %293, %296 : vector<2x128xf32>
    %c1_111 = arith.constant 1 : index
    %c9_112 = arith.constant 9 : index
    %298 = memref.load %arg5[%c1_111, %c9_112] : memref<3x32xf32, #tpu.memory_space<smem>>
    %299 = vector.broadcast %298 : f32 to vector<2x128xf32>
    %300 = arith.mulf %9, %299 : vector<2x128xf32>
    %301 = arith.addf %297, %300 : vector<2x128xf32>
    %c2_113 = arith.constant 2 : index
    %c9_114 = arith.constant 9 : index
    %302 = memref.load %arg5[%c2_113, %c9_114] : memref<3x32xf32, #tpu.memory_space<smem>>
    %303 = vector.broadcast %302 : f32 to vector<2x128xf32>
    %304 = arith.mulf %11, %303 : vector<2x128xf32>
    %305 = arith.addf %301, %304 : vector<2x128xf32>
    %cst_115 = arith.constant 0.000000e+00 : f32
    %306 = vector.broadcast %cst_115 : f32 to vector<2x128xf32>
    %307 = arith.maximumf %305, %306 : vector<2x128xf32>
    %c9_116 = arith.constant 9 : index
    %308 = memref.load %arg8[%c9_116] : memref<32xf32, #tpu.memory_space<smem>>
    %309 = arith.mulf %308, %3 : f32
    %310 = vector.broadcast %309 : f32 to vector<2x128xf32>
    %311 = arith.mulf %307, %310 : vector<2x128xf32>
    %312 = arith.addf %282, %311 : vector<2x128xf32>
    %c10 = arith.constant 10 : index
    %313 = memref.load %arg6[%c10] : memref<32xf32, #tpu.memory_space<smem>>
    %314 = arith.mulf %313, %5 : f32
    %c10_117 = arith.constant 10 : index
    %315 = memref.load %arg7[%c10_117] : memref<32xf32, #tpu.memory_space<smem>>
    %316 = arith.mulf %1, %5 : f32
    %c10_118 = arith.constant 10 : index
    %317 = memref.load %arg6[%c10_118] : memref<32xf32, #tpu.memory_space<smem>>
    %318 = arith.mulf %316, %317 : f32
    %319 = arith.subf %315, %318 : f32
    %320 = vector.broadcast %314 : f32 to vector<2x128xf32>
    %321 = arith.mulf %13, %320 : vector<2x128xf32>
    %322 = vector.broadcast %319 : f32 to vector<2x128xf32>
    %323 = arith.addf %321, %322 : vector<2x128xf32>
    %c0_119 = arith.constant 0 : index
    %c10_120 = arith.constant 10 : index
    %324 = memref.load %arg5[%c0_119, %c10_120] : memref<3x32xf32, #tpu.memory_space<smem>>
    %325 = vector.broadcast %324 : f32 to vector<2x128xf32>
    %326 = arith.mulf %7, %325 : vector<2x128xf32>
    %327 = arith.addf %323, %326 : vector<2x128xf32>
    %c1_121 = arith.constant 1 : index
    %c10_122 = arith.constant 10 : index
    %328 = memref.load %arg5[%c1_121, %c10_122] : memref<3x32xf32, #tpu.memory_space<smem>>
    %329 = vector.broadcast %328 : f32 to vector<2x128xf32>
    %330 = arith.mulf %9, %329 : vector<2x128xf32>
    %331 = arith.addf %327, %330 : vector<2x128xf32>
    %c2_123 = arith.constant 2 : index
    %c10_124 = arith.constant 10 : index
    %332 = memref.load %arg5[%c2_123, %c10_124] : memref<3x32xf32, #tpu.memory_space<smem>>
    %333 = vector.broadcast %332 : f32 to vector<2x128xf32>
    %334 = arith.mulf %11, %333 : vector<2x128xf32>
    %335 = arith.addf %331, %334 : vector<2x128xf32>
    %cst_125 = arith.constant 0.000000e+00 : f32
    %336 = vector.broadcast %cst_125 : f32 to vector<2x128xf32>
    %337 = arith.maximumf %335, %336 : vector<2x128xf32>
    %c10_126 = arith.constant 10 : index
    %338 = memref.load %arg8[%c10_126] : memref<32xf32, #tpu.memory_space<smem>>
    %339 = arith.mulf %338, %3 : f32
    %340 = vector.broadcast %339 : f32 to vector<2x128xf32>
    %341 = arith.mulf %337, %340 : vector<2x128xf32>
    %342 = arith.addf %312, %341 : vector<2x128xf32>
    %c11 = arith.constant 11 : index
    %343 = memref.load %arg6[%c11] : memref<32xf32, #tpu.memory_space<smem>>
    %344 = arith.mulf %343, %5 : f32
    %c11_127 = arith.constant 11 : index
    %345 = memref.load %arg7[%c11_127] : memref<32xf32, #tpu.memory_space<smem>>
    %346 = arith.mulf %1, %5 : f32
    %c11_128 = arith.constant 11 : index
    %347 = memref.load %arg6[%c11_128] : memref<32xf32, #tpu.memory_space<smem>>
    %348 = arith.mulf %346, %347 : f32
    %349 = arith.subf %345, %348 : f32
    %350 = vector.broadcast %344 : f32 to vector<2x128xf32>
    %351 = arith.mulf %13, %350 : vector<2x128xf32>
    %352 = vector.broadcast %349 : f32 to vector<2x128xf32>
    %353 = arith.addf %351, %352 : vector<2x128xf32>
    %c0_129 = arith.constant 0 : index
    %c11_130 = arith.constant 11 : index
    %354 = memref.load %arg5[%c0_129, %c11_130] : memref<3x32xf32, #tpu.memory_space<smem>>
    %355 = vector.broadcast %354 : f32 to vector<2x128xf32>
    %356 = arith.mulf %7, %355 : vector<2x128xf32>
    %357 = arith.addf %353, %356 : vector<2x128xf32>
    %c1_131 = arith.constant 1 : index
    %c11_132 = arith.constant 11 : index
    %358 = memref.load %arg5[%c1_131, %c11_132] : memref<3x32xf32, #tpu.memory_space<smem>>
    %359 = vector.broadcast %358 : f32 to vector<2x128xf32>
    %360 = arith.mulf %9, %359 : vector<2x128xf32>
    %361 = arith.addf %357, %360 : vector<2x128xf32>
    %c2_133 = arith.constant 2 : index
    %c11_134 = arith.constant 11 : index
    %362 = memref.load %arg5[%c2_133, %c11_134] : memref<3x32xf32, #tpu.memory_space<smem>>
    %363 = vector.broadcast %362 : f32 to vector<2x128xf32>
    %364 = arith.mulf %11, %363 : vector<2x128xf32>
    %365 = arith.addf %361, %364 : vector<2x128xf32>
    %cst_135 = arith.constant 0.000000e+00 : f32
    %366 = vector.broadcast %cst_135 : f32 to vector<2x128xf32>
    %367 = arith.maximumf %365, %366 : vector<2x128xf32>
    %c11_136 = arith.constant 11 : index
    %368 = memref.load %arg8[%c11_136] : memref<32xf32, #tpu.memory_space<smem>>
    %369 = arith.mulf %368, %3 : f32
    %370 = vector.broadcast %369 : f32 to vector<2x128xf32>
    %371 = arith.mulf %367, %370 : vector<2x128xf32>
    %372 = arith.addf %342, %371 : vector<2x128xf32>
    %c12 = arith.constant 12 : index
    %373 = memref.load %arg6[%c12] : memref<32xf32, #tpu.memory_space<smem>>
    %374 = arith.mulf %373, %5 : f32
    %c12_137 = arith.constant 12 : index
    %375 = memref.load %arg7[%c12_137] : memref<32xf32, #tpu.memory_space<smem>>
    %376 = arith.mulf %1, %5 : f32
    %c12_138 = arith.constant 12 : index
    %377 = memref.load %arg6[%c12_138] : memref<32xf32, #tpu.memory_space<smem>>
    %378 = arith.mulf %376, %377 : f32
    %379 = arith.subf %375, %378 : f32
    %380 = vector.broadcast %374 : f32 to vector<2x128xf32>
    %381 = arith.mulf %13, %380 : vector<2x128xf32>
    %382 = vector.broadcast %379 : f32 to vector<2x128xf32>
    %383 = arith.addf %381, %382 : vector<2x128xf32>
    %c0_139 = arith.constant 0 : index
    %c12_140 = arith.constant 12 : index
    %384 = memref.load %arg5[%c0_139, %c12_140] : memref<3x32xf32, #tpu.memory_space<smem>>
    %385 = vector.broadcast %384 : f32 to vector<2x128xf32>
    %386 = arith.mulf %7, %385 : vector<2x128xf32>
    %387 = arith.addf %383, %386 : vector<2x128xf32>
    %c1_141 = arith.constant 1 : index
    %c12_142 = arith.constant 12 : index
    %388 = memref.load %arg5[%c1_141, %c12_142] : memref<3x32xf32, #tpu.memory_space<smem>>
    %389 = vector.broadcast %388 : f32 to vector<2x128xf32>
    %390 = arith.mulf %9, %389 : vector<2x128xf32>
    %391 = arith.addf %387, %390 : vector<2x128xf32>
    %c2_143 = arith.constant 2 : index
    %c12_144 = arith.constant 12 : index
    %392 = memref.load %arg5[%c2_143, %c12_144] : memref<3x32xf32, #tpu.memory_space<smem>>
    %393 = vector.broadcast %392 : f32 to vector<2x128xf32>
    %394 = arith.mulf %11, %393 : vector<2x128xf32>
    %395 = arith.addf %391, %394 : vector<2x128xf32>
    %cst_145 = arith.constant 0.000000e+00 : f32
    %396 = vector.broadcast %cst_145 : f32 to vector<2x128xf32>
    %397 = arith.maximumf %395, %396 : vector<2x128xf32>
    %c12_146 = arith.constant 12 : index
    %398 = memref.load %arg8[%c12_146] : memref<32xf32, #tpu.memory_space<smem>>
    %399 = arith.mulf %398, %3 : f32
    %400 = vector.broadcast %399 : f32 to vector<2x128xf32>
    %401 = arith.mulf %397, %400 : vector<2x128xf32>
    %402 = arith.addf %372, %401 : vector<2x128xf32>
    %c13 = arith.constant 13 : index
    %403 = memref.load %arg6[%c13] : memref<32xf32, #tpu.memory_space<smem>>
    %404 = arith.mulf %403, %5 : f32
    %c13_147 = arith.constant 13 : index
    %405 = memref.load %arg7[%c13_147] : memref<32xf32, #tpu.memory_space<smem>>
    %406 = arith.mulf %1, %5 : f32
    %c13_148 = arith.constant 13 : index
    %407 = memref.load %arg6[%c13_148] : memref<32xf32, #tpu.memory_space<smem>>
    %408 = arith.mulf %406, %407 : f32
    %409 = arith.subf %405, %408 : f32
    %410 = vector.broadcast %404 : f32 to vector<2x128xf32>
    %411 = arith.mulf %13, %410 : vector<2x128xf32>
    %412 = vector.broadcast %409 : f32 to vector<2x128xf32>
    %413 = arith.addf %411, %412 : vector<2x128xf32>
    %c0_149 = arith.constant 0 : index
    %c13_150 = arith.constant 13 : index
    %414 = memref.load %arg5[%c0_149, %c13_150] : memref<3x32xf32, #tpu.memory_space<smem>>
    %415 = vector.broadcast %414 : f32 to vector<2x128xf32>
    %416 = arith.mulf %7, %415 : vector<2x128xf32>
    %417 = arith.addf %413, %416 : vector<2x128xf32>
    %c1_151 = arith.constant 1 : index
    %c13_152 = arith.constant 13 : index
    %418 = memref.load %arg5[%c1_151, %c13_152] : memref<3x32xf32, #tpu.memory_space<smem>>
    %419 = vector.broadcast %418 : f32 to vector<2x128xf32>
    %420 = arith.mulf %9, %419 : vector<2x128xf32>
    %421 = arith.addf %417, %420 : vector<2x128xf32>
    %c2_153 = arith.constant 2 : index
    %c13_154 = arith.constant 13 : index
    %422 = memref.load %arg5[%c2_153, %c13_154] : memref<3x32xf32, #tpu.memory_space<smem>>
    %423 = vector.broadcast %422 : f32 to vector<2x128xf32>
    %424 = arith.mulf %11, %423 : vector<2x128xf32>
    %425 = arith.addf %421, %424 : vector<2x128xf32>
    %cst_155 = arith.constant 0.000000e+00 : f32
    %426 = vector.broadcast %cst_155 : f32 to vector<2x128xf32>
    %427 = arith.maximumf %425, %426 : vector<2x128xf32>
    %c13_156 = arith.constant 13 : index
    %428 = memref.load %arg8[%c13_156] : memref<32xf32, #tpu.memory_space<smem>>
    %429 = arith.mulf %428, %3 : f32
    %430 = vector.broadcast %429 : f32 to vector<2x128xf32>
    %431 = arith.mulf %427, %430 : vector<2x128xf32>
    %432 = arith.addf %402, %431 : vector<2x128xf32>
    %c14 = arith.constant 14 : index
    %433 = memref.load %arg6[%c14] : memref<32xf32, #tpu.memory_space<smem>>
    %434 = arith.mulf %433, %5 : f32
    %c14_157 = arith.constant 14 : index
    %435 = memref.load %arg7[%c14_157] : memref<32xf32, #tpu.memory_space<smem>>
    %436 = arith.mulf %1, %5 : f32
    %c14_158 = arith.constant 14 : index
    %437 = memref.load %arg6[%c14_158] : memref<32xf32, #tpu.memory_space<smem>>
    %438 = arith.mulf %436, %437 : f32
    %439 = arith.subf %435, %438 : f32
    %440 = vector.broadcast %434 : f32 to vector<2x128xf32>
    %441 = arith.mulf %13, %440 : vector<2x128xf32>
    %442 = vector.broadcast %439 : f32 to vector<2x128xf32>
    %443 = arith.addf %441, %442 : vector<2x128xf32>
    %c0_159 = arith.constant 0 : index
    %c14_160 = arith.constant 14 : index
    %444 = memref.load %arg5[%c0_159, %c14_160] : memref<3x32xf32, #tpu.memory_space<smem>>
    %445 = vector.broadcast %444 : f32 to vector<2x128xf32>
    %446 = arith.mulf %7, %445 : vector<2x128xf32>
    %447 = arith.addf %443, %446 : vector<2x128xf32>
    %c1_161 = arith.constant 1 : index
    %c14_162 = arith.constant 14 : index
    %448 = memref.load %arg5[%c1_161, %c14_162] : memref<3x32xf32, #tpu.memory_space<smem>>
    %449 = vector.broadcast %448 : f32 to vector<2x128xf32>
    %450 = arith.mulf %9, %449 : vector<2x128xf32>
    %451 = arith.addf %447, %450 : vector<2x128xf32>
    %c2_163 = arith.constant 2 : index
    %c14_164 = arith.constant 14 : index
    %452 = memref.load %arg5[%c2_163, %c14_164] : memref<3x32xf32, #tpu.memory_space<smem>>
    %453 = vector.broadcast %452 : f32 to vector<2x128xf32>
    %454 = arith.mulf %11, %453 : vector<2x128xf32>
    %455 = arith.addf %451, %454 : vector<2x128xf32>
    %cst_165 = arith.constant 0.000000e+00 : f32
    %456 = vector.broadcast %cst_165 : f32 to vector<2x128xf32>
    %457 = arith.maximumf %455, %456 : vector<2x128xf32>
    %c14_166 = arith.constant 14 : index
    %458 = memref.load %arg8[%c14_166] : memref<32xf32, #tpu.memory_space<smem>>
    %459 = arith.mulf %458, %3 : f32
    %460 = vector.broadcast %459 : f32 to vector<2x128xf32>
    %461 = arith.mulf %457, %460 : vector<2x128xf32>
    %462 = arith.addf %432, %461 : vector<2x128xf32>
    %c15 = arith.constant 15 : index
    %463 = memref.load %arg6[%c15] : memref<32xf32, #tpu.memory_space<smem>>
    %464 = arith.mulf %463, %5 : f32
    %c15_167 = arith.constant 15 : index
    %465 = memref.load %arg7[%c15_167] : memref<32xf32, #tpu.memory_space<smem>>
    %466 = arith.mulf %1, %5 : f32
    %c15_168 = arith.constant 15 : index
    %467 = memref.load %arg6[%c15_168] : memref<32xf32, #tpu.memory_space<smem>>
    %468 = arith.mulf %466, %467 : f32
    %469 = arith.subf %465, %468 : f32
    %470 = vector.broadcast %464 : f32 to vector<2x128xf32>
    %471 = arith.mulf %13, %470 : vector<2x128xf32>
    %472 = vector.broadcast %469 : f32 to vector<2x128xf32>
    %473 = arith.addf %471, %472 : vector<2x128xf32>
    %c0_169 = arith.constant 0 : index
    %c15_170 = arith.constant 15 : index
    %474 = memref.load %arg5[%c0_169, %c15_170] : memref<3x32xf32, #tpu.memory_space<smem>>
    %475 = vector.broadcast %474 : f32 to vector<2x128xf32>
    %476 = arith.mulf %7, %475 : vector<2x128xf32>
    %477 = arith.addf %473, %476 : vector<2x128xf32>
    %c1_171 = arith.constant 1 : index
    %c15_172 = arith.constant 15 : index
    %478 = memref.load %arg5[%c1_171, %c15_172] : memref<3x32xf32, #tpu.memory_space<smem>>
    %479 = vector.broadcast %478 : f32 to vector<2x128xf32>
    %480 = arith.mulf %9, %479 : vector<2x128xf32>
    %481 = arith.addf %477, %480 : vector<2x128xf32>
    %c2_173 = arith.constant 2 : index
    %c15_174 = arith.constant 15 : index
    %482 = memref.load %arg5[%c2_173, %c15_174] : memref<3x32xf32, #tpu.memory_space<smem>>
    %483 = vector.broadcast %482 : f32 to vector<2x128xf32>
    %484 = arith.mulf %11, %483 : vector<2x128xf32>
    %485 = arith.addf %481, %484 : vector<2x128xf32>
    %cst_175 = arith.constant 0.000000e+00 : f32
    %486 = vector.broadcast %cst_175 : f32 to vector<2x128xf32>
    %487 = arith.maximumf %485, %486 : vector<2x128xf32>
    %c15_176 = arith.constant 15 : index
    %488 = memref.load %arg8[%c15_176] : memref<32xf32, #tpu.memory_space<smem>>
    %489 = arith.mulf %488, %3 : f32
    %490 = vector.broadcast %489 : f32 to vector<2x128xf32>
    %491 = arith.mulf %487, %490 : vector<2x128xf32>
    %492 = arith.addf %462, %491 : vector<2x128xf32>
    %c16 = arith.constant 16 : index
    %493 = memref.load %arg6[%c16] : memref<32xf32, #tpu.memory_space<smem>>
    %494 = arith.mulf %493, %5 : f32
    %c16_177 = arith.constant 16 : index
    %495 = memref.load %arg7[%c16_177] : memref<32xf32, #tpu.memory_space<smem>>
    %496 = arith.mulf %1, %5 : f32
    %c16_178 = arith.constant 16 : index
    %497 = memref.load %arg6[%c16_178] : memref<32xf32, #tpu.memory_space<smem>>
    %498 = arith.mulf %496, %497 : f32
    %499 = arith.subf %495, %498 : f32
    %500 = vector.broadcast %494 : f32 to vector<2x128xf32>
    %501 = arith.mulf %13, %500 : vector<2x128xf32>
    %502 = vector.broadcast %499 : f32 to vector<2x128xf32>
    %503 = arith.addf %501, %502 : vector<2x128xf32>
    %c0_179 = arith.constant 0 : index
    %c16_180 = arith.constant 16 : index
    %504 = memref.load %arg5[%c0_179, %c16_180] : memref<3x32xf32, #tpu.memory_space<smem>>
    %505 = vector.broadcast %504 : f32 to vector<2x128xf32>
    %506 = arith.mulf %7, %505 : vector<2x128xf32>
    %507 = arith.addf %503, %506 : vector<2x128xf32>
    %c1_181 = arith.constant 1 : index
    %c16_182 = arith.constant 16 : index
    %508 = memref.load %arg5[%c1_181, %c16_182] : memref<3x32xf32, #tpu.memory_space<smem>>
    %509 = vector.broadcast %508 : f32 to vector<2x128xf32>
    %510 = arith.mulf %9, %509 : vector<2x128xf32>
    %511 = arith.addf %507, %510 : vector<2x128xf32>
    %c2_183 = arith.constant 2 : index
    %c16_184 = arith.constant 16 : index
    %512 = memref.load %arg5[%c2_183, %c16_184] : memref<3x32xf32, #tpu.memory_space<smem>>
    %513 = vector.broadcast %512 : f32 to vector<2x128xf32>
    %514 = arith.mulf %11, %513 : vector<2x128xf32>
    %515 = arith.addf %511, %514 : vector<2x128xf32>
    %cst_185 = arith.constant 0.000000e+00 : f32
    %516 = vector.broadcast %cst_185 : f32 to vector<2x128xf32>
    %517 = arith.maximumf %515, %516 : vector<2x128xf32>
    %c16_186 = arith.constant 16 : index
    %518 = memref.load %arg8[%c16_186] : memref<32xf32, #tpu.memory_space<smem>>
    %519 = arith.mulf %518, %3 : f32
    %520 = vector.broadcast %519 : f32 to vector<2x128xf32>
    %521 = arith.mulf %517, %520 : vector<2x128xf32>
    %522 = arith.addf %492, %521 : vector<2x128xf32>
    %c17 = arith.constant 17 : index
    %523 = memref.load %arg6[%c17] : memref<32xf32, #tpu.memory_space<smem>>
    %524 = arith.mulf %523, %5 : f32
    %c17_187 = arith.constant 17 : index
    %525 = memref.load %arg7[%c17_187] : memref<32xf32, #tpu.memory_space<smem>>
    %526 = arith.mulf %1, %5 : f32
    %c17_188 = arith.constant 17 : index
    %527 = memref.load %arg6[%c17_188] : memref<32xf32, #tpu.memory_space<smem>>
    %528 = arith.mulf %526, %527 : f32
    %529 = arith.subf %525, %528 : f32
    %530 = vector.broadcast %524 : f32 to vector<2x128xf32>
    %531 = arith.mulf %13, %530 : vector<2x128xf32>
    %532 = vector.broadcast %529 : f32 to vector<2x128xf32>
    %533 = arith.addf %531, %532 : vector<2x128xf32>
    %c0_189 = arith.constant 0 : index
    %c17_190 = arith.constant 17 : index
    %534 = memref.load %arg5[%c0_189, %c17_190] : memref<3x32xf32, #tpu.memory_space<smem>>
    %535 = vector.broadcast %534 : f32 to vector<2x128xf32>
    %536 = arith.mulf %7, %535 : vector<2x128xf32>
    %537 = arith.addf %533, %536 : vector<2x128xf32>
    %c1_191 = arith.constant 1 : index
    %c17_192 = arith.constant 17 : index
    %538 = memref.load %arg5[%c1_191, %c17_192] : memref<3x32xf32, #tpu.memory_space<smem>>
    %539 = vector.broadcast %538 : f32 to vector<2x128xf32>
    %540 = arith.mulf %9, %539 : vector<2x128xf32>
    %541 = arith.addf %537, %540 : vector<2x128xf32>
    %c2_193 = arith.constant 2 : index
    %c17_194 = arith.constant 17 : index
    %542 = memref.load %arg5[%c2_193, %c17_194] : memref<3x32xf32, #tpu.memory_space<smem>>
    %543 = vector.broadcast %542 : f32 to vector<2x128xf32>
    %544 = arith.mulf %11, %543 : vector<2x128xf32>
    %545 = arith.addf %541, %544 : vector<2x128xf32>
    %cst_195 = arith.constant 0.000000e+00 : f32
    %546 = vector.broadcast %cst_195 : f32 to vector<2x128xf32>
    %547 = arith.maximumf %545, %546 : vector<2x128xf32>
    %c17_196 = arith.constant 17 : index
    %548 = memref.load %arg8[%c17_196] : memref<32xf32, #tpu.memory_space<smem>>
    %549 = arith.mulf %548, %3 : f32
    %550 = vector.broadcast %549 : f32 to vector<2x128xf32>
    %551 = arith.mulf %547, %550 : vector<2x128xf32>
    %552 = arith.addf %522, %551 : vector<2x128xf32>
    %c18 = arith.constant 18 : index
    %553 = memref.load %arg6[%c18] : memref<32xf32, #tpu.memory_space<smem>>
    %554 = arith.mulf %553, %5 : f32
    %c18_197 = arith.constant 18 : index
    %555 = memref.load %arg7[%c18_197] : memref<32xf32, #tpu.memory_space<smem>>
    %556 = arith.mulf %1, %5 : f32
    %c18_198 = arith.constant 18 : index
    %557 = memref.load %arg6[%c18_198] : memref<32xf32, #tpu.memory_space<smem>>
    %558 = arith.mulf %556, %557 : f32
    %559 = arith.subf %555, %558 : f32
    %560 = vector.broadcast %554 : f32 to vector<2x128xf32>
    %561 = arith.mulf %13, %560 : vector<2x128xf32>
    %562 = vector.broadcast %559 : f32 to vector<2x128xf32>
    %563 = arith.addf %561, %562 : vector<2x128xf32>
    %c0_199 = arith.constant 0 : index
    %c18_200 = arith.constant 18 : index
    %564 = memref.load %arg5[%c0_199, %c18_200] : memref<3x32xf32, #tpu.memory_space<smem>>
    %565 = vector.broadcast %564 : f32 to vector<2x128xf32>
    %566 = arith.mulf %7, %565 : vector<2x128xf32>
    %567 = arith.addf %563, %566 : vector<2x128xf32>
    %c1_201 = arith.constant 1 : index
    %c18_202 = arith.constant 18 : index
    %568 = memref.load %arg5[%c1_201, %c18_202] : memref<3x32xf32, #tpu.memory_space<smem>>
    %569 = vector.broadcast %568 : f32 to vector<2x128xf32>
    %570 = arith.mulf %9, %569 : vector<2x128xf32>
    %571 = arith.addf %567, %570 : vector<2x128xf32>
    %c2_203 = arith.constant 2 : index
    %c18_204 = arith.constant 18 : index
    %572 = memref.load %arg5[%c2_203, %c18_204] : memref<3x32xf32, #tpu.memory_space<smem>>
    %573 = vector.broadcast %572 : f32 to vector<2x128xf32>
    %574 = arith.mulf %11, %573 : vector<2x128xf32>
    %575 = arith.addf %571, %574 : vector<2x128xf32>
    %cst_205 = arith.constant 0.000000e+00 : f32
    %576 = vector.broadcast %cst_205 : f32 to vector<2x128xf32>
    %577 = arith.maximumf %575, %576 : vector<2x128xf32>
    %c18_206 = arith.constant 18 : index
    %578 = memref.load %arg8[%c18_206] : memref<32xf32, #tpu.memory_space<smem>>
    %579 = arith.mulf %578, %3 : f32
    %580 = vector.broadcast %579 : f32 to vector<2x128xf32>
    %581 = arith.mulf %577, %580 : vector<2x128xf32>
    %582 = arith.addf %552, %581 : vector<2x128xf32>
    %c19 = arith.constant 19 : index
    %583 = memref.load %arg6[%c19] : memref<32xf32, #tpu.memory_space<smem>>
    %584 = arith.mulf %583, %5 : f32
    %c19_207 = arith.constant 19 : index
    %585 = memref.load %arg7[%c19_207] : memref<32xf32, #tpu.memory_space<smem>>
    %586 = arith.mulf %1, %5 : f32
    %c19_208 = arith.constant 19 : index
    %587 = memref.load %arg6[%c19_208] : memref<32xf32, #tpu.memory_space<smem>>
    %588 = arith.mulf %586, %587 : f32
    %589 = arith.subf %585, %588 : f32
    %590 = vector.broadcast %584 : f32 to vector<2x128xf32>
    %591 = arith.mulf %13, %590 : vector<2x128xf32>
    %592 = vector.broadcast %589 : f32 to vector<2x128xf32>
    %593 = arith.addf %591, %592 : vector<2x128xf32>
    %c0_209 = arith.constant 0 : index
    %c19_210 = arith.constant 19 : index
    %594 = memref.load %arg5[%c0_209, %c19_210] : memref<3x32xf32, #tpu.memory_space<smem>>
    %595 = vector.broadcast %594 : f32 to vector<2x128xf32>
    %596 = arith.mulf %7, %595 : vector<2x128xf32>
    %597 = arith.addf %593, %596 : vector<2x128xf32>
    %c1_211 = arith.constant 1 : index
    %c19_212 = arith.constant 19 : index
    %598 = memref.load %arg5[%c1_211, %c19_212] : memref<3x32xf32, #tpu.memory_space<smem>>
    %599 = vector.broadcast %598 : f32 to vector<2x128xf32>
    %600 = arith.mulf %9, %599 : vector<2x128xf32>
    %601 = arith.addf %597, %600 : vector<2x128xf32>
    %c2_213 = arith.constant 2 : index
    %c19_214 = arith.constant 19 : index
    %602 = memref.load %arg5[%c2_213, %c19_214] : memref<3x32xf32, #tpu.memory_space<smem>>
    %603 = vector.broadcast %602 : f32 to vector<2x128xf32>
    %604 = arith.mulf %11, %603 : vector<2x128xf32>
    %605 = arith.addf %601, %604 : vector<2x128xf32>
    %cst_215 = arith.constant 0.000000e+00 : f32
    %606 = vector.broadcast %cst_215 : f32 to vector<2x128xf32>
    %607 = arith.maximumf %605, %606 : vector<2x128xf32>
    %c19_216 = arith.constant 19 : index
    %608 = memref.load %arg8[%c19_216] : memref<32xf32, #tpu.memory_space<smem>>
    %609 = arith.mulf %608, %3 : f32
    %610 = vector.broadcast %609 : f32 to vector<2x128xf32>
    %611 = arith.mulf %607, %610 : vector<2x128xf32>
    %612 = arith.addf %582, %611 : vector<2x128xf32>
    %c20 = arith.constant 20 : index
    %613 = memref.load %arg6[%c20] : memref<32xf32, #tpu.memory_space<smem>>
    %614 = arith.mulf %613, %5 : f32
    %c20_217 = arith.constant 20 : index
    %615 = memref.load %arg7[%c20_217] : memref<32xf32, #tpu.memory_space<smem>>
    %616 = arith.mulf %1, %5 : f32
    %c20_218 = arith.constant 20 : index
    %617 = memref.load %arg6[%c20_218] : memref<32xf32, #tpu.memory_space<smem>>
    %618 = arith.mulf %616, %617 : f32
    %619 = arith.subf %615, %618 : f32
    %620 = vector.broadcast %614 : f32 to vector<2x128xf32>
    %621 = arith.mulf %13, %620 : vector<2x128xf32>
    %622 = vector.broadcast %619 : f32 to vector<2x128xf32>
    %623 = arith.addf %621, %622 : vector<2x128xf32>
    %c0_219 = arith.constant 0 : index
    %c20_220 = arith.constant 20 : index
    %624 = memref.load %arg5[%c0_219, %c20_220] : memref<3x32xf32, #tpu.memory_space<smem>>
    %625 = vector.broadcast %624 : f32 to vector<2x128xf32>
    %626 = arith.mulf %7, %625 : vector<2x128xf32>
    %627 = arith.addf %623, %626 : vector<2x128xf32>
    %c1_221 = arith.constant 1 : index
    %c20_222 = arith.constant 20 : index
    %628 = memref.load %arg5[%c1_221, %c20_222] : memref<3x32xf32, #tpu.memory_space<smem>>
    %629 = vector.broadcast %628 : f32 to vector<2x128xf32>
    %630 = arith.mulf %9, %629 : vector<2x128xf32>
    %631 = arith.addf %627, %630 : vector<2x128xf32>
    %c2_223 = arith.constant 2 : index
    %c20_224 = arith.constant 20 : index
    %632 = memref.load %arg5[%c2_223, %c20_224] : memref<3x32xf32, #tpu.memory_space<smem>>
    %633 = vector.broadcast %632 : f32 to vector<2x128xf32>
    %634 = arith.mulf %11, %633 : vector<2x128xf32>
    %635 = arith.addf %631, %634 : vector<2x128xf32>
    %cst_225 = arith.constant 0.000000e+00 : f32
    %636 = vector.broadcast %cst_225 : f32 to vector<2x128xf32>
    %637 = arith.maximumf %635, %636 : vector<2x128xf32>
    %c20_226 = arith.constant 20 : index
    %638 = memref.load %arg8[%c20_226] : memref<32xf32, #tpu.memory_space<smem>>
    %639 = arith.mulf %638, %3 : f32
    %640 = vector.broadcast %639 : f32 to vector<2x128xf32>
    %641 = arith.mulf %637, %640 : vector<2x128xf32>
    %642 = arith.addf %612, %641 : vector<2x128xf32>
    %c21 = arith.constant 21 : index
    %643 = memref.load %arg6[%c21] : memref<32xf32, #tpu.memory_space<smem>>
    %644 = arith.mulf %643, %5 : f32
    %c21_227 = arith.constant 21 : index
    %645 = memref.load %arg7[%c21_227] : memref<32xf32, #tpu.memory_space<smem>>
    %646 = arith.mulf %1, %5 : f32
    %c21_228 = arith.constant 21 : index
    %647 = memref.load %arg6[%c21_228] : memref<32xf32, #tpu.memory_space<smem>>
    %648 = arith.mulf %646, %647 : f32
    %649 = arith.subf %645, %648 : f32
    %650 = vector.broadcast %644 : f32 to vector<2x128xf32>
    %651 = arith.mulf %13, %650 : vector<2x128xf32>
    %652 = vector.broadcast %649 : f32 to vector<2x128xf32>
    %653 = arith.addf %651, %652 : vector<2x128xf32>
    %c0_229 = arith.constant 0 : index
    %c21_230 = arith.constant 21 : index
    %654 = memref.load %arg5[%c0_229, %c21_230] : memref<3x32xf32, #tpu.memory_space<smem>>
    %655 = vector.broadcast %654 : f32 to vector<2x128xf32>
    %656 = arith.mulf %7, %655 : vector<2x128xf32>
    %657 = arith.addf %653, %656 : vector<2x128xf32>
    %c1_231 = arith.constant 1 : index
    %c21_232 = arith.constant 21 : index
    %658 = memref.load %arg5[%c1_231, %c21_232] : memref<3x32xf32, #tpu.memory_space<smem>>
    %659 = vector.broadcast %658 : f32 to vector<2x128xf32>
    %660 = arith.mulf %9, %659 : vector<2x128xf32>
    %661 = arith.addf %657, %660 : vector<2x128xf32>
    %c2_233 = arith.constant 2 : index
    %c21_234 = arith.constant 21 : index
    %662 = memref.load %arg5[%c2_233, %c21_234] : memref<3x32xf32, #tpu.memory_space<smem>>
    %663 = vector.broadcast %662 : f32 to vector<2x128xf32>
    %664 = arith.mulf %11, %663 : vector<2x128xf32>
    %665 = arith.addf %661, %664 : vector<2x128xf32>
    %cst_235 = arith.constant 0.000000e+00 : f32
    %666 = vector.broadcast %cst_235 : f32 to vector<2x128xf32>
    %667 = arith.maximumf %665, %666 : vector<2x128xf32>
    %c21_236 = arith.constant 21 : index
    %668 = memref.load %arg8[%c21_236] : memref<32xf32, #tpu.memory_space<smem>>
    %669 = arith.mulf %668, %3 : f32
    %670 = vector.broadcast %669 : f32 to vector<2x128xf32>
    %671 = arith.mulf %667, %670 : vector<2x128xf32>
    %672 = arith.addf %642, %671 : vector<2x128xf32>
    %c22 = arith.constant 22 : index
    %673 = memref.load %arg6[%c22] : memref<32xf32, #tpu.memory_space<smem>>
    %674 = arith.mulf %673, %5 : f32
    %c22_237 = arith.constant 22 : index
    %675 = memref.load %arg7[%c22_237] : memref<32xf32, #tpu.memory_space<smem>>
    %676 = arith.mulf %1, %5 : f32
    %c22_238 = arith.constant 22 : index
    %677 = memref.load %arg6[%c22_238] : memref<32xf32, #tpu.memory_space<smem>>
    %678 = arith.mulf %676, %677 : f32
    %679 = arith.subf %675, %678 : f32
    %680 = vector.broadcast %674 : f32 to vector<2x128xf32>
    %681 = arith.mulf %13, %680 : vector<2x128xf32>
    %682 = vector.broadcast %679 : f32 to vector<2x128xf32>
    %683 = arith.addf %681, %682 : vector<2x128xf32>
    %c0_239 = arith.constant 0 : index
    %c22_240 = arith.constant 22 : index
    %684 = memref.load %arg5[%c0_239, %c22_240] : memref<3x32xf32, #tpu.memory_space<smem>>
    %685 = vector.broadcast %684 : f32 to vector<2x128xf32>
    %686 = arith.mulf %7, %685 : vector<2x128xf32>
    %687 = arith.addf %683, %686 : vector<2x128xf32>
    %c1_241 = arith.constant 1 : index
    %c22_242 = arith.constant 22 : index
    %688 = memref.load %arg5[%c1_241, %c22_242] : memref<3x32xf32, #tpu.memory_space<smem>>
    %689 = vector.broadcast %688 : f32 to vector<2x128xf32>
    %690 = arith.mulf %9, %689 : vector<2x128xf32>
    %691 = arith.addf %687, %690 : vector<2x128xf32>
    %c2_243 = arith.constant 2 : index
    %c22_244 = arith.constant 22 : index
    %692 = memref.load %arg5[%c2_243, %c22_244] : memref<3x32xf32, #tpu.memory_space<smem>>
    %693 = vector.broadcast %692 : f32 to vector<2x128xf32>
    %694 = arith.mulf %11, %693 : vector<2x128xf32>
    %695 = arith.addf %691, %694 : vector<2x128xf32>
    %cst_245 = arith.constant 0.000000e+00 : f32
    %696 = vector.broadcast %cst_245 : f32 to vector<2x128xf32>
    %697 = arith.maximumf %695, %696 : vector<2x128xf32>
    %c22_246 = arith.constant 22 : index
    %698 = memref.load %arg8[%c22_246] : memref<32xf32, #tpu.memory_space<smem>>
    %699 = arith.mulf %698, %3 : f32
    %700 = vector.broadcast %699 : f32 to vector<2x128xf32>
    %701 = arith.mulf %697, %700 : vector<2x128xf32>
    %702 = arith.addf %672, %701 : vector<2x128xf32>
    %c23 = arith.constant 23 : index
    %703 = memref.load %arg6[%c23] : memref<32xf32, #tpu.memory_space<smem>>
    %704 = arith.mulf %703, %5 : f32
    %c23_247 = arith.constant 23 : index
    %705 = memref.load %arg7[%c23_247] : memref<32xf32, #tpu.memory_space<smem>>
    %706 = arith.mulf %1, %5 : f32
    %c23_248 = arith.constant 23 : index
    %707 = memref.load %arg6[%c23_248] : memref<32xf32, #tpu.memory_space<smem>>
    %708 = arith.mulf %706, %707 : f32
    %709 = arith.subf %705, %708 : f32
    %710 = vector.broadcast %704 : f32 to vector<2x128xf32>
    %711 = arith.mulf %13, %710 : vector<2x128xf32>
    %712 = vector.broadcast %709 : f32 to vector<2x128xf32>
    %713 = arith.addf %711, %712 : vector<2x128xf32>
    %c0_249 = arith.constant 0 : index
    %c23_250 = arith.constant 23 : index
    %714 = memref.load %arg5[%c0_249, %c23_250] : memref<3x32xf32, #tpu.memory_space<smem>>
    %715 = vector.broadcast %714 : f32 to vector<2x128xf32>
    %716 = arith.mulf %7, %715 : vector<2x128xf32>
    %717 = arith.addf %713, %716 : vector<2x128xf32>
    %c1_251 = arith.constant 1 : index
    %c23_252 = arith.constant 23 : index
    %718 = memref.load %arg5[%c1_251, %c23_252] : memref<3x32xf32, #tpu.memory_space<smem>>
    %719 = vector.broadcast %718 : f32 to vector<2x128xf32>
    %720 = arith.mulf %9, %719 : vector<2x128xf32>
    %721 = arith.addf %717, %720 : vector<2x128xf32>
    %c2_253 = arith.constant 2 : index
    %c23_254 = arith.constant 23 : index
    %722 = memref.load %arg5[%c2_253, %c23_254] : memref<3x32xf32, #tpu.memory_space<smem>>
    %723 = vector.broadcast %722 : f32 to vector<2x128xf32>
    %724 = arith.mulf %11, %723 : vector<2x128xf32>
    %725 = arith.addf %721, %724 : vector<2x128xf32>
    %cst_255 = arith.constant 0.000000e+00 : f32
    %726 = vector.broadcast %cst_255 : f32 to vector<2x128xf32>
    %727 = arith.maximumf %725, %726 : vector<2x128xf32>
    %c23_256 = arith.constant 23 : index
    %728 = memref.load %arg8[%c23_256] : memref<32xf32, #tpu.memory_space<smem>>
    %729 = arith.mulf %728, %3 : f32
    %730 = vector.broadcast %729 : f32 to vector<2x128xf32>
    %731 = arith.mulf %727, %730 : vector<2x128xf32>
    %732 = arith.addf %702, %731 : vector<2x128xf32>
    %c24 = arith.constant 24 : index
    %733 = memref.load %arg6[%c24] : memref<32xf32, #tpu.memory_space<smem>>
    %734 = arith.mulf %733, %5 : f32
    %c24_257 = arith.constant 24 : index
    %735 = memref.load %arg7[%c24_257] : memref<32xf32, #tpu.memory_space<smem>>
    %736 = arith.mulf %1, %5 : f32
    %c24_258 = arith.constant 24 : index
    %737 = memref.load %arg6[%c24_258] : memref<32xf32, #tpu.memory_space<smem>>
    %738 = arith.mulf %736, %737 : f32
    %739 = arith.subf %735, %738 : f32
    %740 = vector.broadcast %734 : f32 to vector<2x128xf32>
    %741 = arith.mulf %13, %740 : vector<2x128xf32>
    %742 = vector.broadcast %739 : f32 to vector<2x128xf32>
    %743 = arith.addf %741, %742 : vector<2x128xf32>
    %c0_259 = arith.constant 0 : index
    %c24_260 = arith.constant 24 : index
    %744 = memref.load %arg5[%c0_259, %c24_260] : memref<3x32xf32, #tpu.memory_space<smem>>
    %745 = vector.broadcast %744 : f32 to vector<2x128xf32>
    %746 = arith.mulf %7, %745 : vector<2x128xf32>
    %747 = arith.addf %743, %746 : vector<2x128xf32>
    %c1_261 = arith.constant 1 : index
    %c24_262 = arith.constant 24 : index
    %748 = memref.load %arg5[%c1_261, %c24_262] : memref<3x32xf32, #tpu.memory_space<smem>>
    %749 = vector.broadcast %748 : f32 to vector<2x128xf32>
    %750 = arith.mulf %9, %749 : vector<2x128xf32>
    %751 = arith.addf %747, %750 : vector<2x128xf32>
    %c2_263 = arith.constant 2 : index
    %c24_264 = arith.constant 24 : index
    %752 = memref.load %arg5[%c2_263, %c24_264] : memref<3x32xf32, #tpu.memory_space<smem>>
    %753 = vector.broadcast %752 : f32 to vector<2x128xf32>
    %754 = arith.mulf %11, %753 : vector<2x128xf32>
    %755 = arith.addf %751, %754 : vector<2x128xf32>
    %cst_265 = arith.constant 0.000000e+00 : f32
    %756 = vector.broadcast %cst_265 : f32 to vector<2x128xf32>
    %757 = arith.maximumf %755, %756 : vector<2x128xf32>
    %c24_266 = arith.constant 24 : index
    %758 = memref.load %arg8[%c24_266] : memref<32xf32, #tpu.memory_space<smem>>
    %759 = arith.mulf %758, %3 : f32
    %760 = vector.broadcast %759 : f32 to vector<2x128xf32>
    %761 = arith.mulf %757, %760 : vector<2x128xf32>
    %762 = arith.addf %732, %761 : vector<2x128xf32>
    %c25 = arith.constant 25 : index
    %763 = memref.load %arg6[%c25] : memref<32xf32, #tpu.memory_space<smem>>
    %764 = arith.mulf %763, %5 : f32
    %c25_267 = arith.constant 25 : index
    %765 = memref.load %arg7[%c25_267] : memref<32xf32, #tpu.memory_space<smem>>
    %766 = arith.mulf %1, %5 : f32
    %c25_268 = arith.constant 25 : index
    %767 = memref.load %arg6[%c25_268] : memref<32xf32, #tpu.memory_space<smem>>
    %768 = arith.mulf %766, %767 : f32
    %769 = arith.subf %765, %768 : f32
    %770 = vector.broadcast %764 : f32 to vector<2x128xf32>
    %771 = arith.mulf %13, %770 : vector<2x128xf32>
    %772 = vector.broadcast %769 : f32 to vector<2x128xf32>
    %773 = arith.addf %771, %772 : vector<2x128xf32>
    %c0_269 = arith.constant 0 : index
    %c25_270 = arith.constant 25 : index
    %774 = memref.load %arg5[%c0_269, %c25_270] : memref<3x32xf32, #tpu.memory_space<smem>>
    %775 = vector.broadcast %774 : f32 to vector<2x128xf32>
    %776 = arith.mulf %7, %775 : vector<2x128xf32>
    %777 = arith.addf %773, %776 : vector<2x128xf32>
    %c1_271 = arith.constant 1 : index
    %c25_272 = arith.constant 25 : index
    %778 = memref.load %arg5[%c1_271, %c25_272] : memref<3x32xf32, #tpu.memory_space<smem>>
    %779 = vector.broadcast %778 : f32 to vector<2x128xf32>
    %780 = arith.mulf %9, %779 : vector<2x128xf32>
    %781 = arith.addf %777, %780 : vector<2x128xf32>
    %c2_273 = arith.constant 2 : index
    %c25_274 = arith.constant 25 : index
    %782 = memref.load %arg5[%c2_273, %c25_274] : memref<3x32xf32, #tpu.memory_space<smem>>
    %783 = vector.broadcast %782 : f32 to vector<2x128xf32>
    %784 = arith.mulf %11, %783 : vector<2x128xf32>
    %785 = arith.addf %781, %784 : vector<2x128xf32>
    %cst_275 = arith.constant 0.000000e+00 : f32
    %786 = vector.broadcast %cst_275 : f32 to vector<2x128xf32>
    %787 = arith.maximumf %785, %786 : vector<2x128xf32>
    %c25_276 = arith.constant 25 : index
    %788 = memref.load %arg8[%c25_276] : memref<32xf32, #tpu.memory_space<smem>>
    %789 = arith.mulf %788, %3 : f32
    %790 = vector.broadcast %789 : f32 to vector<2x128xf32>
    %791 = arith.mulf %787, %790 : vector<2x128xf32>
    %792 = arith.addf %762, %791 : vector<2x128xf32>
    %c26 = arith.constant 26 : index
    %793 = memref.load %arg6[%c26] : memref<32xf32, #tpu.memory_space<smem>>
    %794 = arith.mulf %793, %5 : f32
    %c26_277 = arith.constant 26 : index
    %795 = memref.load %arg7[%c26_277] : memref<32xf32, #tpu.memory_space<smem>>
    %796 = arith.mulf %1, %5 : f32
    %c26_278 = arith.constant 26 : index
    %797 = memref.load %arg6[%c26_278] : memref<32xf32, #tpu.memory_space<smem>>
    %798 = arith.mulf %796, %797 : f32
    %799 = arith.subf %795, %798 : f32
    %800 = vector.broadcast %794 : f32 to vector<2x128xf32>
    %801 = arith.mulf %13, %800 : vector<2x128xf32>
    %802 = vector.broadcast %799 : f32 to vector<2x128xf32>
    %803 = arith.addf %801, %802 : vector<2x128xf32>
    %c0_279 = arith.constant 0 : index
    %c26_280 = arith.constant 26 : index
    %804 = memref.load %arg5[%c0_279, %c26_280] : memref<3x32xf32, #tpu.memory_space<smem>>
    %805 = vector.broadcast %804 : f32 to vector<2x128xf32>
    %806 = arith.mulf %7, %805 : vector<2x128xf32>
    %807 = arith.addf %803, %806 : vector<2x128xf32>
    %c1_281 = arith.constant 1 : index
    %c26_282 = arith.constant 26 : index
    %808 = memref.load %arg5[%c1_281, %c26_282] : memref<3x32xf32, #tpu.memory_space<smem>>
    %809 = vector.broadcast %808 : f32 to vector<2x128xf32>
    %810 = arith.mulf %9, %809 : vector<2x128xf32>
    %811 = arith.addf %807, %810 : vector<2x128xf32>
    %c2_283 = arith.constant 2 : index
    %c26_284 = arith.constant 26 : index
    %812 = memref.load %arg5[%c2_283, %c26_284] : memref<3x32xf32, #tpu.memory_space<smem>>
    %813 = vector.broadcast %812 : f32 to vector<2x128xf32>
    %814 = arith.mulf %11, %813 : vector<2x128xf32>
    %815 = arith.addf %811, %814 : vector<2x128xf32>
    %cst_285 = arith.constant 0.000000e+00 : f32
    %816 = vector.broadcast %cst_285 : f32 to vector<2x128xf32>
    %817 = arith.maximumf %815, %816 : vector<2x128xf32>
    %c26_286 = arith.constant 26 : index
    %818 = memref.load %arg8[%c26_286] : memref<32xf32, #tpu.memory_space<smem>>
    %819 = arith.mulf %818, %3 : f32
    %820 = vector.broadcast %819 : f32 to vector<2x128xf32>
    %821 = arith.mulf %817, %820 : vector<2x128xf32>
    %822 = arith.addf %792, %821 : vector<2x128xf32>
    %c27 = arith.constant 27 : index
    %823 = memref.load %arg6[%c27] : memref<32xf32, #tpu.memory_space<smem>>
    %824 = arith.mulf %823, %5 : f32
    %c27_287 = arith.constant 27 : index
    %825 = memref.load %arg7[%c27_287] : memref<32xf32, #tpu.memory_space<smem>>
    %826 = arith.mulf %1, %5 : f32
    %c27_288 = arith.constant 27 : index
    %827 = memref.load %arg6[%c27_288] : memref<32xf32, #tpu.memory_space<smem>>
    %828 = arith.mulf %826, %827 : f32
    %829 = arith.subf %825, %828 : f32
    %830 = vector.broadcast %824 : f32 to vector<2x128xf32>
    %831 = arith.mulf %13, %830 : vector<2x128xf32>
    %832 = vector.broadcast %829 : f32 to vector<2x128xf32>
    %833 = arith.addf %831, %832 : vector<2x128xf32>
    %c0_289 = arith.constant 0 : index
    %c27_290 = arith.constant 27 : index
    %834 = memref.load %arg5[%c0_289, %c27_290] : memref<3x32xf32, #tpu.memory_space<smem>>
    %835 = vector.broadcast %834 : f32 to vector<2x128xf32>
    %836 = arith.mulf %7, %835 : vector<2x128xf32>
    %837 = arith.addf %833, %836 : vector<2x128xf32>
    %c1_291 = arith.constant 1 : index
    %c27_292 = arith.constant 27 : index
    %838 = memref.load %arg5[%c1_291, %c27_292] : memref<3x32xf32, #tpu.memory_space<smem>>
    %839 = vector.broadcast %838 : f32 to vector<2x128xf32>
    %840 = arith.mulf %9, %839 : vector<2x128xf32>
    %841 = arith.addf %837, %840 : vector<2x128xf32>
    %c2_293 = arith.constant 2 : index
    %c27_294 = arith.constant 27 : index
    %842 = memref.load %arg5[%c2_293, %c27_294] : memref<3x32xf32, #tpu.memory_space<smem>>
    %843 = vector.broadcast %842 : f32 to vector<2x128xf32>
    %844 = arith.mulf %11, %843 : vector<2x128xf32>
    %845 = arith.addf %841, %844 : vector<2x128xf32>
    %cst_295 = arith.constant 0.000000e+00 : f32
    %846 = vector.broadcast %cst_295 : f32 to vector<2x128xf32>
    %847 = arith.maximumf %845, %846 : vector<2x128xf32>
    %c27_296 = arith.constant 27 : index
    %848 = memref.load %arg8[%c27_296] : memref<32xf32, #tpu.memory_space<smem>>
    %849 = arith.mulf %848, %3 : f32
    %850 = vector.broadcast %849 : f32 to vector<2x128xf32>
    %851 = arith.mulf %847, %850 : vector<2x128xf32>
    %852 = arith.addf %822, %851 : vector<2x128xf32>
    %c28 = arith.constant 28 : index
    %853 = memref.load %arg6[%c28] : memref<32xf32, #tpu.memory_space<smem>>
    %854 = arith.mulf %853, %5 : f32
    %c28_297 = arith.constant 28 : index
    %855 = memref.load %arg7[%c28_297] : memref<32xf32, #tpu.memory_space<smem>>
    %856 = arith.mulf %1, %5 : f32
    %c28_298 = arith.constant 28 : index
    %857 = memref.load %arg6[%c28_298] : memref<32xf32, #tpu.memory_space<smem>>
    %858 = arith.mulf %856, %857 : f32
    %859 = arith.subf %855, %858 : f32
    %860 = vector.broadcast %854 : f32 to vector<2x128xf32>
    %861 = arith.mulf %13, %860 : vector<2x128xf32>
    %862 = vector.broadcast %859 : f32 to vector<2x128xf32>
    %863 = arith.addf %861, %862 : vector<2x128xf32>
    %c0_299 = arith.constant 0 : index
    %c28_300 = arith.constant 28 : index
    %864 = memref.load %arg5[%c0_299, %c28_300] : memref<3x32xf32, #tpu.memory_space<smem>>
    %865 = vector.broadcast %864 : f32 to vector<2x128xf32>
    %866 = arith.mulf %7, %865 : vector<2x128xf32>
    %867 = arith.addf %863, %866 : vector<2x128xf32>
    %c1_301 = arith.constant 1 : index
    %c28_302 = arith.constant 28 : index
    %868 = memref.load %arg5[%c1_301, %c28_302] : memref<3x32xf32, #tpu.memory_space<smem>>
    %869 = vector.broadcast %868 : f32 to vector<2x128xf32>
    %870 = arith.mulf %9, %869 : vector<2x128xf32>
    %871 = arith.addf %867, %870 : vector<2x128xf32>
    %c2_303 = arith.constant 2 : index
    %c28_304 = arith.constant 28 : index
    %872 = memref.load %arg5[%c2_303, %c28_304] : memref<3x32xf32, #tpu.memory_space<smem>>
    %873 = vector.broadcast %872 : f32 to vector<2x128xf32>
    %874 = arith.mulf %11, %873 : vector<2x128xf32>
    %875 = arith.addf %871, %874 : vector<2x128xf32>
    %cst_305 = arith.constant 0.000000e+00 : f32
    %876 = vector.broadcast %cst_305 : f32 to vector<2x128xf32>
    %877 = arith.maximumf %875, %876 : vector<2x128xf32>
    %c28_306 = arith.constant 28 : index
    %878 = memref.load %arg8[%c28_306] : memref<32xf32, #tpu.memory_space<smem>>
    %879 = arith.mulf %878, %3 : f32
    %880 = vector.broadcast %879 : f32 to vector<2x128xf32>
    %881 = arith.mulf %877, %880 : vector<2x128xf32>
    %882 = arith.addf %852, %881 : vector<2x128xf32>
    %c29 = arith.constant 29 : index
    %883 = memref.load %arg6[%c29] : memref<32xf32, #tpu.memory_space<smem>>
    %884 = arith.mulf %883, %5 : f32
    %c29_307 = arith.constant 29 : index
    %885 = memref.load %arg7[%c29_307] : memref<32xf32, #tpu.memory_space<smem>>
    %886 = arith.mulf %1, %5 : f32
    %c29_308 = arith.constant 29 : index
    %887 = memref.load %arg6[%c29_308] : memref<32xf32, #tpu.memory_space<smem>>
    %888 = arith.mulf %886, %887 : f32
    %889 = arith.subf %885, %888 : f32
    %890 = vector.broadcast %884 : f32 to vector<2x128xf32>
    %891 = arith.mulf %13, %890 : vector<2x128xf32>
    %892 = vector.broadcast %889 : f32 to vector<2x128xf32>
    %893 = arith.addf %891, %892 : vector<2x128xf32>
    %c0_309 = arith.constant 0 : index
    %c29_310 = arith.constant 29 : index
    %894 = memref.load %arg5[%c0_309, %c29_310] : memref<3x32xf32, #tpu.memory_space<smem>>
    %895 = vector.broadcast %894 : f32 to vector<2x128xf32>
    %896 = arith.mulf %7, %895 : vector<2x128xf32>
    %897 = arith.addf %893, %896 : vector<2x128xf32>
    %c1_311 = arith.constant 1 : index
    %c29_312 = arith.constant 29 : index
    %898 = memref.load %arg5[%c1_311, %c29_312] : memref<3x32xf32, #tpu.memory_space<smem>>
    %899 = vector.broadcast %898 : f32 to vector<2x128xf32>
    %900 = arith.mulf %9, %899 : vector<2x128xf32>
    %901 = arith.addf %897, %900 : vector<2x128xf32>
    %c2_313 = arith.constant 2 : index
    %c29_314 = arith.constant 29 : index
    %902 = memref.load %arg5[%c2_313, %c29_314] : memref<3x32xf32, #tpu.memory_space<smem>>
    %903 = vector.broadcast %902 : f32 to vector<2x128xf32>
    %904 = arith.mulf %11, %903 : vector<2x128xf32>
    %905 = arith.addf %901, %904 : vector<2x128xf32>
    %cst_315 = arith.constant 0.000000e+00 : f32
    %906 = vector.broadcast %cst_315 : f32 to vector<2x128xf32>
    %907 = arith.maximumf %905, %906 : vector<2x128xf32>
    %c29_316 = arith.constant 29 : index
    %908 = memref.load %arg8[%c29_316] : memref<32xf32, #tpu.memory_space<smem>>
    %909 = arith.mulf %908, %3 : f32
    %910 = vector.broadcast %909 : f32 to vector<2x128xf32>
    %911 = arith.mulf %907, %910 : vector<2x128xf32>
    %912 = arith.addf %882, %911 : vector<2x128xf32>
    %c30 = arith.constant 30 : index
    %913 = memref.load %arg6[%c30] : memref<32xf32, #tpu.memory_space<smem>>
    %914 = arith.mulf %913, %5 : f32
    %c30_317 = arith.constant 30 : index
    %915 = memref.load %arg7[%c30_317] : memref<32xf32, #tpu.memory_space<smem>>
    %916 = arith.mulf %1, %5 : f32
    %c30_318 = arith.constant 30 : index
    %917 = memref.load %arg6[%c30_318] : memref<32xf32, #tpu.memory_space<smem>>
    %918 = arith.mulf %916, %917 : f32
    %919 = arith.subf %915, %918 : f32
    %920 = vector.broadcast %914 : f32 to vector<2x128xf32>
    %921 = arith.mulf %13, %920 : vector<2x128xf32>
    %922 = vector.broadcast %919 : f32 to vector<2x128xf32>
    %923 = arith.addf %921, %922 : vector<2x128xf32>
    %c0_319 = arith.constant 0 : index
    %c30_320 = arith.constant 30 : index
    %924 = memref.load %arg5[%c0_319, %c30_320] : memref<3x32xf32, #tpu.memory_space<smem>>
    %925 = vector.broadcast %924 : f32 to vector<2x128xf32>
    %926 = arith.mulf %7, %925 : vector<2x128xf32>
    %927 = arith.addf %923, %926 : vector<2x128xf32>
    %c1_321 = arith.constant 1 : index
    %c30_322 = arith.constant 30 : index
    %928 = memref.load %arg5[%c1_321, %c30_322] : memref<3x32xf32, #tpu.memory_space<smem>>
    %929 = vector.broadcast %928 : f32 to vector<2x128xf32>
    %930 = arith.mulf %9, %929 : vector<2x128xf32>
    %931 = arith.addf %927, %930 : vector<2x128xf32>
    %c2_323 = arith.constant 2 : index
    %c30_324 = arith.constant 30 : index
    %932 = memref.load %arg5[%c2_323, %c30_324] : memref<3x32xf32, #tpu.memory_space<smem>>
    %933 = vector.broadcast %932 : f32 to vector<2x128xf32>
    %934 = arith.mulf %11, %933 : vector<2x128xf32>
    %935 = arith.addf %931, %934 : vector<2x128xf32>
    %cst_325 = arith.constant 0.000000e+00 : f32
    %936 = vector.broadcast %cst_325 : f32 to vector<2x128xf32>
    %937 = arith.maximumf %935, %936 : vector<2x128xf32>
    %c30_326 = arith.constant 30 : index
    %938 = memref.load %arg8[%c30_326] : memref<32xf32, #tpu.memory_space<smem>>
    %939 = arith.mulf %938, %3 : f32
    %940 = vector.broadcast %939 : f32 to vector<2x128xf32>
    %941 = arith.mulf %937, %940 : vector<2x128xf32>
    %942 = arith.addf %912, %941 : vector<2x128xf32>
    %c31 = arith.constant 31 : index
    %943 = memref.load %arg6[%c31] : memref<32xf32, #tpu.memory_space<smem>>
    %944 = arith.mulf %943, %5 : f32
    %c31_327 = arith.constant 31 : index
    %945 = memref.load %arg7[%c31_327] : memref<32xf32, #tpu.memory_space<smem>>
    %946 = arith.mulf %1, %5 : f32
    %c31_328 = arith.constant 31 : index
    %947 = memref.load %arg6[%c31_328] : memref<32xf32, #tpu.memory_space<smem>>
    %948 = arith.mulf %946, %947 : f32
    %949 = arith.subf %945, %948 : f32
    %950 = vector.broadcast %944 : f32 to vector<2x128xf32>
    %951 = arith.mulf %13, %950 : vector<2x128xf32>
    %952 = vector.broadcast %949 : f32 to vector<2x128xf32>
    %953 = arith.addf %951, %952 : vector<2x128xf32>
    %c0_329 = arith.constant 0 : index
    %c31_330 = arith.constant 31 : index
    %954 = memref.load %arg5[%c0_329, %c31_330] : memref<3x32xf32, #tpu.memory_space<smem>>
    %955 = vector.broadcast %954 : f32 to vector<2x128xf32>
    %956 = arith.mulf %7, %955 : vector<2x128xf32>
    %957 = arith.addf %953, %956 : vector<2x128xf32>
    %c1_331 = arith.constant 1 : index
    %c31_332 = arith.constant 31 : index
    %958 = memref.load %arg5[%c1_331, %c31_332] : memref<3x32xf32, #tpu.memory_space<smem>>
    %959 = vector.broadcast %958 : f32 to vector<2x128xf32>
    %960 = arith.mulf %9, %959 : vector<2x128xf32>
    %961 = arith.addf %957, %960 : vector<2x128xf32>
    %c2_333 = arith.constant 2 : index
    %c31_334 = arith.constant 31 : index
    %962 = memref.load %arg5[%c2_333, %c31_334] : memref<3x32xf32, #tpu.memory_space<smem>>
    %963 = vector.broadcast %962 : f32 to vector<2x128xf32>
    %964 = arith.mulf %11, %963 : vector<2x128xf32>
    %965 = arith.addf %961, %964 : vector<2x128xf32>
    %cst_335 = arith.constant 0.000000e+00 : f32
    %966 = vector.broadcast %cst_335 : f32 to vector<2x128xf32>
    %967 = arith.maximumf %965, %966 : vector<2x128xf32>
    %c31_336 = arith.constant 31 : index
    %968 = memref.load %arg8[%c31_336] : memref<32xf32, #tpu.memory_space<smem>>
    %969 = arith.mulf %968, %3 : f32
    %970 = vector.broadcast %969 : f32 to vector<2x128xf32>
    %971 = arith.mulf %967, %970 : vector<2x128xf32>
    %972 = arith.addf %942, %971 : vector<2x128xf32>
    %c0_337 = arith.constant 0 : index
    %973 = memref.load %arg9[%c0_337] : memref<1xf32, #tpu.memory_space<smem>>
    %974 = arith.mulf %973, %3 : f32
    %975 = arith.addf %974, %1 : f32
    %976 = vector.broadcast %975 : f32 to vector<2x128xf32>
    %977 = arith.addf %972, %976 : vector<2x128xf32>
    %c0_338 = arith.constant 0 : index
    %c0_339 = arith.constant 0 : index
    %c0_340 = arith.constant 0 : index
    %978 = vector.load %arg10[%c0_338, %c0_339, %c0_340] : memref<1x2x128xf32, #tpu.memory_space<vmem>>, vector<1x2x128xf32>
    %979 = vector.shape_cast %978 : vector<1x2x128xf32> to vector<2x128xf32>
    %980 = vector.shape_cast %977 : vector<2x128xf32> to vector<1x2x128xf32>
    tpu.vector_store %arg10[%c0_338, %c0_339, %c0_340], %980 {strides = array<i32>} : memref<1x2x128xf32, #tpu.memory_space<vmem>>, vector<1x2x128xf32>,
    return
  }
  func.func @transform_0(%arg0: i32, %arg1: i32) -> (i32, i32, i32, i32) {
    %c0_i32 = arith.constant 0 : i32
    %c0_i32_0 = arith.constant 0 : i32
    %c0_i32_1 = arith.constant 0 : i32
    return %arg0, %c0_i32, %arg1, %c0_i32_0 : i32, i32, i32, i32
  }
  func.func @transform_1(%arg0: i32, %arg1: i32) -> (i32, i32, i32) {
    %c0_i32 = arith.constant 0 : i32
    %c0_i32_0 = arith.constant 0 : i32
    return %arg0, %arg1, %c0_i32 : i32, i32, i32
  }
  func.func @transform_2(%arg0: i32, %arg1: i32) -> (i32, i32) {
    %c0_i32 = arith.constant 0 : i32
    %c0_i32_0 = arith.constant 0 : i32
    %c0_i32_1 = arith.constant 0 : i32
    return %c0_i32, %c0_i32_0 : i32, i32
  }
  func.func @transform_3(%arg0: i32, %arg1: i32) -> (i32, i32) {
    %c0_i32 = arith.constant 0 : i32
    %c0_i32_0 = arith.constant 0 : i32
    %c0_i32_1 = arith.constant 0 : i32
    return %c0_i32, %c0_i32_0 : i32, i32
  }
  func.func @transform_4(%arg0: i32, %arg1: i32) -> i32 {
    %c0_i32 = arith.constant 0 : i32
    %c0_i32_0 = arith.constant 0 : i32
    return %c0_i32 : i32
  }
  func.func @transform_5(%arg0: i32, %arg1: i32) -> i32 {
    %c0_i32 = arith.constant 0 : i32
    %c0_i32_0 = arith.constant 0 : i32
    return %c0_i32 : i32
  }
  func.func @transform_6(%arg0: i32, %arg1: i32) -> i32 {
    %c0_i32 = arith.constant 0 : i32
    %c0_i32_0 = arith.constant 0 : i32
    return %c0_i32 : i32
  }
  func.func @transform_7(%arg0: i32, %arg1: i32) -> i32 {
    %c0_i32 = arith.constant 0 : i32
    %c0_i32_0 = arith.constant 0 : i32
    return %c0_i32 : i32
  }
  func.func @transform_8(%arg0: i32, %arg1: i32) -> (i32, i32, i32) {
    %c0_i32 = arith.constant 0 : i32
    %c0_i32_0 = arith.constant 0 : i32
    return %arg0, %arg1, %c0_i32 : i32, i32, i32
  }
}

</mosaic_0001>

<bundles_post_ra>
// kernel: tpu_custom_call.1
= control target key start
LH: loop header
LB: loop body
LE: loop exit
PB: predicated region body
PF: predicated region fallthrough
CT: control target
= control target key end

     0   :  { %s3264_s0 = inlined_call_operand.hbm [shape: f32[2,3,2,128], index: 0, kind: input, shape index: {}]   ;;  %s3265_s1 = inlined_call_operand.vmem [shape: f32[2,2,128], index: 1, kind: input, shape index: {}]   ;;  %s3266_s2 = inlined_call_operand.vmem [shape: f32[2,3], index: 2, kind: input, shape index: {}]   ;;  %s3267_s3 = inlined_call_operand.vmem [shape: f32[3,32], index: 3, kind: input, shape index: {}]   ;;  %s3268_s4 = inlined_call_operand.vmem [shape: f32[32], index: 4, kind: input, shape index: {}]   ;;  %s3269_s5 = inlined_call_operand.vmem [shape: f32[32], index: 5, kind: input, shape index: {}]   ;;  %s3270_s6 = inlined_call_operand.vmem [shape: f32[32], index: 6, kind: input, shape index: {}]   ;;  %s3271_s7 = inlined_call_operand.<no memory space> [shape: f32[1], index: 7, kind: input, shape index: {}]   ;;  %s3272_s8 = inlined_call_operand.hbm [shape: f32[2,2,128], index: 8, kind: output, shape index: {}]  }
   0x1   :  { %3285 = sst [smem:[#allocation28_spill]] %s3264_s0 }
   0x2   :  { %3286 = sst [smem:[#allocation29_spill]] %s3265_s1 }
   0x3   :  { %3287 = sst [smem:[#allocation30_spill]] %s3266_s2 }
   0x4   :  { %3288 = sst [smem:[#allocation31_spill]] %s3267_s3 }
   0x5   :  { %3289 = sst [smem:[#allocation32_spill]] %s3268_s4 }
   0x6   :  { %3290 = sst [smem:[#allocation33_spill]] %s3269_s5 }
   0x7   :  { %3291 = sst [smem:[#allocation34_spill]] %s3270_s6 }
   0x8   :  { %13 = sst [smem:[#allocation2]] %s3271_s7 }
   0x9   :  { %14 = vsyncpa [#allocation4], 0 }
   0xa   :  { %16 = vsyncpa [#allocation4 + $0x1], 0 }
   0xb   :  { %17 = vsyncpa [#allocation6], 0 }
   0xc   :  { %18 = vsyncpa [#allocation9], 0 }
   0xd   :  { %19 = vsyncpa [#allocation12], 0 }
   0xe   :  { %20 = vsyncpa [#allocation5], 0 }
   0xf   :  { %22 = vsyncpa [#allocation5 + $0x1], 0  ;;  %s2070_s29 = smov 0   ;;  %s2072_s30 = smov 0  }
  0x10   :  { %s2074_s9 = smov 0   ;;  %s2076_s10 = smov 0  }
  0x11   :  { %s2078_s11 = smov 0   ;;  %s2080_s12 = smov 0  }
  0x12 LB: > { %3292 = sst [smem:[#allocation20_spill]] %s1991_s29  ;;  %s3297_s3 = sld [smem:[#allocation31_spill]]  ;;  %s2011_s12 = sphi %s2080_s12, %s28_s12   ;;  %s2007_s11 = sphi %s2078_s11, %s3329_s11   ;;  %s2003_s10 = sphi %s2076_s10, %s3328_s10   ;;  %s1999_s9 = sphi %s2074_s9, %s3327_s9   ;;  %s1995_s30 = sphi %s2072_s30, %s3326_s30   ;;  %s1991_s29 = sphi %s2070_s29, %s3325_s29  }
  0x13   : > { %3293 = sst [smem:[#allocation21_spill]] %s1995_s30  ;;  %s1477_s15 = sadd.s32 4294967295, %s2011_s12  }
  0x14   : > { %3294 = sst [smem:[#allocation22_spill]] %s1999_s9  ;;  %p1479_p0 = scmp.ge.s32.totalorder %s2011_s12, 1 }
  0x15   : > { %3295 = sst [smem:[#allocation23_spill]] %s2007_s11  ;;  %p2107_p1 = scmp.eq.s32.totalorder %s1477_s15, 0 }
  0x16   : > { %3296 = sst [smem:[#allocation24_spill]] %s2011_s12  ;;  %p255_p2 = scmp.lt.s32.totalorder %s2011_s12, 3 }
  0x17   : > { %s3298_s16 = scalar_select %p2107_p1, 1, 0 }
  0x18   : > { %s279_s14 = sshll.u32 %s3297_s3, 4  ;;  %p2112_p3 = pnand %p1479_p0, %p255_p2  ;;  %s280_s14 = int_to_ptr.vmem [resolvable:$true] %s279_s14 }
  0x19   : > { %s3300_s5 = sld [smem:[#allocation33_spill]]  ;;  %s3301_s2 = sld [smem:[#allocation30_spill]] }
  0x1a   : > { %s3299_s17 = scalar_select %p2112_p3, 1, 0 }
  0x1b   : > { %p1717_p5 = pneg %p2112_p3  ;;  %s3303_s4 = sld [smem:[#allocation32_spill]] }
  0x1c   : > { %s1812_s28 = scalar_lea.vmem %s280_s14, 64  ;;  %p1820_p11 = scmp.lt.s32.totalorder %s280_s14, %s280_s14 }
  0x1d   : > { %p2127_p6 = pnand %p1717_p5, %p2107_p1  ;;  %p1813_p7 = scmp.ne.s32.totalorder %s280_s14, %s1812_s28 }
  0x1e   : > { %p1821_p12 = scmp.lt.s32.totalorder %s1812_s28, %s1812_s28 }
  0x1f   : > { %s301_s20 = sshll.u32 %s3300_s5, 4  ;;  %s268_s23 = sshll.u32 %s3301_s2, 4  ;;  %s302_s20 = int_to_ptr.vmem [resolvable:$true] %s301_s20  ;;  %s2131_s23 = int_to_ptr.vmem [resolvable:$true] %s268_s23 }
  0x20   : > { %p2138_p8 = pneg %p2127_p6  ;;  %p1822_p13 = por %p1821_p12, %p1820_p11 }
  0x21   : > { %s290_s27 = sshll.u32 %s3303_s4, 4  ;;  %s291_s27 = int_to_ptr.vmem [resolvable:$true] %s290_s27 }
  0x22   : > { %p1815_p9 = pnand %p2138_p8, %p1813_p7 }
  0x24   : > { %p1816_p10 = pneg %p1815_p9 }
  0x26   : > { %p1823_p0 = pnand %p1822_p13, %p1816_p10 }
  0x28   : > { %1826 = shalt.err (!%p1823_p0)
}
  0x29   : > { %s2013_s13 = smov [#allocation8]   ;;  %s1827_s18 = scalar_lea.vmem %s302_s20, 16 }
  0x2a   : > { %1723 = dma.vmem_to_smem (!%p2127_p6), %s280_s14, 64, %s2013_s13, [#allocation9]  }
  0x2b   : > { %p1828_p2 = scmp.ne.s32.totalorder %s302_s20, %s1827_s18  ;;  %p1835_p3 = scmp.lt.s32.totalorder %s302_s20, %s302_s20 }
  0x2c   : > { %p1836_p1 = scmp.lt.s32.totalorder %s1827_s18, %s1827_s18 }
  0x2d   : > { %p1830_p5 = pnand %p1828_p2, %p2138_p8 }
  0x2e   : > { %p1837_p7 = por %p1836_p1, %p1835_p3 }
  0x2f   : > { %p1831_p4 = pneg %p1830_p5 }
  0x31   : > { %p1838_p9 = pnand %p1837_p7, %p1831_p4 }
  0x33   : > { %1841 = shalt.err (!%p1838_p9)
}
  0x34   : > { %s2014_s19 = smov [#allocation11]   ;;  %s1842_s21 = scalar_lea.vmem %s2131_s23, 32 }
  0x35   : > { %1729 = dma.vmem_to_smem (!%p2127_p6), %s302_s20, 16, %s2014_s19, [#allocation12]  }
  0x36   : > { %p1843_p10 = scmp.ne.s32.totalorder %s2131_s23, %s1842_s21  ;;  %p1850_p13 = scmp.lt.s32.totalorder %s2131_s23, %s2131_s23 }
  0x37   : > { %p1851_p0 = scmp.lt.s32.totalorder %s1842_s21, %s1842_s21 }
  0x38   : > { %p1845_p11 = pnand %p1843_p10, %p2138_p8 }
  0x39   : > { %p1852_p2 = por %p1851_p0, %p1850_p13 }
  0x3a   : > { %p1846_p12 = pneg %p1845_p11 }
  0x3c   : > { %p1853_p1 = pnand %p1852_p2, %p1846_p12 }
  0x3e   : > { %1856 = shalt.err (!%p1853_p1)
}
  0x3f   : > { %s2015_s14 = smov [#allocation7]   ;;  %s1857_s20 = scalar_lea.vmem %s291_s27, 16 }
  0x40   : > { %1720 = dma.vmem_to_smem (!%p2127_p6), %s2131_s23, 32, %s2015_s14, [#allocation6]  }
  0x41   : > { %p1858_p3 = scmp.ne.s32.totalorder %s291_s27, %s1857_s20  ;;  %p1865_p7 = scmp.lt.s32.totalorder %s291_s27, %s291_s27 }
  0x42   : > { %p1866_p9 = scmp.lt.s32.totalorder %s1857_s20, %s1857_s20 }
  0x43   : > { %p1860_p4 = pnand %p1858_p3, %p2138_p8 }
  0x44   : > { %p1867_p10 = por %p1866_p9, %p1865_p7 }
  0x45   : > { %p1861_p5 = pneg %p1860_p4 }
  0x47   : > { %p1868_p11 = pnand %p1867_p10, %p1861_p5 }
  0x49   : > { %1871 = shalt.err (!%p1868_p11)
}
  0x4a   : > { %s2016_s26 = smov [#allocation10]   ;;  %s3305_s6 = sld [smem:[#allocation34_spill]] }
  0x4b   : > { %1726 = dma.vmem_to_smem (!%p2127_p6), %s291_s27, 16, %s2016_s26, [#allocation9]  }
  0x50   : > { %s312_s13 = sshll.u32 %s3305_s6, 4  ;;  %s313_s13 = int_to_ptr.vmem [resolvable:$true] %s312_s13 }
  0x51   : > { %s1872_s18 = scalar_lea.vmem %s313_s13, 16  ;;  %p1880_p2 = scmp.lt.s32.totalorder %s313_s13, %s313_s13 }
  0x52   : > { %p1873_p12 = scmp.ne.s32.totalorder %s313_s13, %s1872_s18  ;;  %p1881_p1 = scmp.lt.s32.totalorder %s1872_s18, %s1872_s18 }
  0x54   : > { %p1875_p13 = pnand %p1873_p12, %p2138_p8  ;;  %p1882_p3 = por %p1881_p1, %p1880_p2 }
  0x56   : > { %p1876_p0 = pneg %p1875_p13 }
  0x58   : > { %p1883_p4 = pnand %p1882_p3, %p1876_p0 }
  0x5a   : > { %1886 = shalt.err (!%p1883_p4)
}
  0x5b   : > { %s2017_s19 = smov [#allocation13]   ;;  %s1478_s27 = sadd.s32 4294967294, %s2011_s12  }
  0x5c   : > { %1732 = dma.vmem_to_smem (!%p2127_p6), %s313_s13, 16, %s2017_s19, [#allocation12]  }
  0x5d   : > { %s40_s7 = sadd.s32 1, %s2007_s11  ;;  %s49_s21 = sadd.s32 1, %s1999_s9 }
  0x5e   : > { %p42_p8 = scmp.ge.s32.totalorder %s40_s7, 2  ;;  %p56_p5 = scmp.ne.s32.totalorder %s1999_s9, %s1995_s30 }
  0x5f   : > { %p57_p7 = scmp.eq.s32.totalorder %s2011_s12, 0  ;;  %p62_p9 = scmp.ne.s32.totalorder %s1995_s30, %s1991_s29 }
  0x60   : > { %s3331_s7 = smov (%p42_p8, %s40_s7), 0  ;;  %p3308_p11 = scmp.ne.s32.totalorder %s3298_s16, 0 }
  0x61   : > { %3306 = sst [smem:[#allocation25_spill]] %s3331_s7  ;;  %p2184_p10 = por %p57_p7, %p56_p5 }
  0x62   : > { %p2190_p6 = por %p3308_p11, %p62_p9  ;;  %s44_s22 = ssub.s32 %s2007_s11, %s3331_s7 }
  0x63   : > { %p242_p12 = scmp.eq.s32.totalorder %s1477_s15, 1  ;;  %p47_p13 = scmp.eq.s32.totalorder %s44_s22, 0 }
  0x64   : > { %p248_p0 = scmp.eq.s32.totalorder %s1478_s27, 1  ;;  %p1746_p1 = scmp.lt.s32.totalorder %s2011_s12, 2 }
  0x65   : > { %p2198_p2 = por %p242_p12, %p56_p5  ;;  %s326_s23 = sand.u32 1, %s1999_s9  }
  0x66   : > { %s2204_s20 = scalar_select %p47_p13, %s1999_s9, %s49_s21  }
  0x67   : > { %s3310_s25 = scalar_select %p2198_p2, 1, 0 }
  0x68   : > { %3311 = sst [smem:[#allocation26_spill]] %s2204_s20  ;;  %p2206_p3 = por %p248_p0, %p62_p9 }
  0x69   : > { %s1690_s28 = smul.u32 6, %s326_s23  ;;  %p2214_p4 = pnand %p1746_p1, %p2184_p10 }
  0x6a   : > { %s3312_s26 = scalar_select %p2206_p3, 1, 0 }
  0x6b   : > { %s1691_s13 = smul.u32 96, %s2007_s11  ;;  %s3315_s0 = sld [smem:[#allocation28_spill]] }
  0x6c   : > { %3313 = sst [smem:[#allocation27_spill]] %s3312_s26  ;;  %s330_s21 = scalar_lea.vmem [#allocation3], %s1690_s28 }
  0x6d   : > { %s338_s22 = sshll.u32 %s330_s21, 4  ;;  %s2225_s24 = scalar_lea.sflag [#allocation4], %s326_s23  ;;  %s2223_s22 = int_to_ptr.vmem [resolvable:$true] %s338_s22 }
  0x6e   : > { %p1889_p5 = pneg %p2214_p4 }
  0x71   : > { %s2221_s27 = scalar_lea.hbm %s3315_s0, %s1691_s13  ;;  %s1892_s19 = scalar_lea.hbm %s3315_s0, 192 }
  0x72   : > { %s1887_s2 = scalar_lea.hbm %s2221_s27, 96  ;;  %p1893_p10 = scmp.lt.u32.totalorder %s2221_s27, %s3315_s0 }
  0x73   : > { %p1888_p8 = scmp.ne.s32.totalorder %s2221_s27, %s1887_s2  ;;  %p1894_p11 = scmp.lt.u32.totalorder %s1892_s19, %s1887_s2 }
  0x74   : > { %p1896_p13 = scmp.lt.u32.totalorder %s1887_s2, %s2221_s27 }
  0x75   : > { %p1890_p7 = pnand %p1889_p5, %p1888_p8  ;;  %p1895_p12 = por %p1894_p11, %p1893_p10 }
  0x77   : > { %p1891_p9 = pneg %p1890_p7  ;;  %p1897_p0 = por %p1896_p13, %p1895_p12 }
  0x79   : > { %p1898_p1 = pnand %p1897_p0, %p1891_p9 }
  0x7b   : > { %1901 = shalt.err (!%p1898_p1)
}
  0x7c   : > { %s1902_s23 = scalar_lea.vmem %s2223_s22, 96  ;;  %s2018_s28 = smov [#allocation3]  }
  0x7d   : > { %p1903_p8 = scmp.ne.s32.totalorder %s2223_s22, %s1902_s23  ;;  %s1907_s21 = sshll.u32 %s2018_s28, 4  ;;  %s1908_s21 = int_to_ptr.vmem [resolvable:$false] %s1907_s21 }
  0x7e   : > { %s1909_s3 = scalar_lea.vmem %s1908_s21, 192  ;;  %p1910_p2 = scmp.lt.s32.totalorder %s2223_s22, %s1908_s21 }
  0x7f   : > { %p1905_p7 = pnand %p1903_p8, %p1889_p5  ;;  %p1911_p10 = scmp.lt.s32.totalorder %s1909_s3, %s1902_s23 }
  0x81   : > { %p1906_p3 = pneg %p1905_p7  ;;  %p1912_p11 = por %p1911_p10, %p1910_p2 }
  0x83   : > { %p1913_p12 = pnand %p1912_p11, %p1906_p3 }
  0x85   : > { %1916 = shalt.err (!%p1913_p12)
}
  0x86   : > { %s2019_s2 = smov 32   ;;  %s2020_s4 = smov 2  }
  0x87   : > { %1736 = dma.hbm_to_vmem [thread:$0]  (!%p2214_p4), %s2221_s27, 96, %s2223_s22, %s2225_s24, %s2019_s2, %s2019_s2, %s2020_s4  }
  0x88   : > { %p3316_p5 = scmp.ne.s32.totalorder %s3299_s17, 0 }
  0x89   : > { %s2256_s13 = sand.u32 (!%p3316_p5), 1, %s1995_s30  }
  0x8a   : > { %360 = sbr.rel (%p3316_p5) target bundleno = 355 (0x163), region = 52  ;;  %s363_s19 = scalar_lea.sflag (!%p3316_p5), [#allocation4], %s2256_s13 }
  0x8b   : > { %s1692_s15 = smul.u32 (!%p3316_p5), 6, %s2256_s13 }
  0x8d   : > { %s2260_s23 = scalar_lea.vmem (!%p3316_p5), [#allocation3], %s1692_s15 }
  0x91   : > { %1970 = dma.done.wait (%p2190_p6), %s363_s19, 96  }
  0x92   : > { %1972 = vsyncadd (%p2190_p6), %s363_s19, 4294967200  ;;  %p3317_p2 = scmp.ne.s32.totalorder %s3298_s16, 0 }
  0x94   : > { %1974 = dma.done.wait (%p3317_p2), [#allocation6], 32  }
  0x95   : > { %1976 = vsyncadd (%p3317_p2), [#allocation6], 4294967264 }
  0x96   : > { %1978 = dma.done.wait (%p3317_p2), [#allocation9], 80  }
  0x97   : > { %1980 = vsyncadd (%p3317_p2), [#allocation9], 4294967216 }
  0x98   : > { %1982 = dma.done.wait (%p3317_p2), [#allocation12], 32  }
  0x99   : > { %1984 = vsyncadd (%p3317_p2), [#allocation12], 4294967264 }
  0x9a   : > { %391 = sfence }
  0x9b   : > { %p427_p6 = scmp.lt.s32.totalorder %s2003_s10, 1  ;;  %s1495_s17 = sshll.u32 %s2003_s10, 7  ;;  %v2325_v2 = vld [vmem:[%s2260_s23] sm:$0x3]  ;;  %v2336_v5 = vld [vmem:[%s2260_s23 + $0x2] sm:$0x3] }
  0x9c   : > { %s2281_s18 = sld [smem:[#allocation7 + %s1495_s17]]  ;;  %s436_s27 = sadd.s32 1, %s1495_s17  ;;  %v2342_v7 = vld [vmem:[%s2260_s23 + $0x4] sm:$0x3] }
  0x9d   : > { %s428_s14 = scalar_select %p427_p6, %s2003_s10, 1 }
  0x9e   : > { %s2283_s24 = sld [smem:[#allocation7 + %s436_s27]]  ;;  %s438_s16 = sadd.s32 2, %s1495_s17 }
  0x9f   : > { %s1494_s22 = sshll.u32 %s428_s14, 1  ;;  %s3318_s1 = sld [smem:[#allocation29_spill]] }
  0xa0   : > { %s2290_s2 = sld [smem:[#allocation7 + %s438_s16]]  ;;  %p3319_p4 = scmp.ne.s32.totalorder %s3310_s25, 0 }
  0xa1   : > { %s446_s4 = sld [smem:[#allocation10]]  ;;  %s2298_s28 = sld [smem:[#allocation10 + $0x1]] }
  0xa2   : > { %s448_s15 = sld [smem:[#allocation11]]  ;;  %s2302_s17 = sld [smem:[#allocation8 + $0x1]] }
  0xa3   : > { %s456_s19 = sld [smem:[#allocation8]]  ;;  %s2304_s21 = sld [smem:[#allocation8 + $0x81]] }
  0xa4   : > { %s2292_s0 = sld [smem:[#allocation8 + $0x80]]  ;;  %s2306_s16 = sld [smem:[#allocation8 + $0x101]] }
  0xa5   : > { %s2288_s3 = scalar_lea.vmem %s3318_s1, %s1494_s22  ;;  %s2294_s14 = sld [smem:[#allocation8 + $0x100]] }
  0xa6   : > { %s2296_s27 = sld [smem:[#allocation13]]  ;;  %s2300_s22 = sld [smem:[#allocation11 + $0x1]]  ;;  %v2312_v0 = vld [vmem:[%s2288_s3] sm:$0x3] }
  0xa7   : > { %s447_s1 = smul.f32 %s446_s4, %s2290_s2  ;;  %s2309_s5 = sld [smem:[#allocation13 + $0x1]] }
  0xa8   : > { %s2316_s6 = smul.f32 %s2290_s2, %s2281_s18  ;;  %s2318_s7 = sld [smem:[#allocation10 + $0x2]]  ;;  %v483_v10 = vstv %s2302_s17 }
  0xa9   : > { %v452_v1 = vstv %s447_s1  ;;  %s2320_s11 = sld [smem:[#allocation11 + $0x2]]  ;;  %v457_v3 = vstv %s456_s19  ;;  %s474_s29 = smul.f32 %s2298_s28, %s2290_s2  ;;  %v487_v16 = vstv %s2304_s21  ;;  %v484_v18 = vmul.f32 %v483_v10, %v2325_v2 }
  0xaa   : > { %s2322_s20 = sld [smem:[#allocation8 + $0x2]]  ;;  %s450_s9 = smul.f32 %s2316_s6, %s446_s4  ;;  %v453_v4 = vmul.f32 %v452_v1, %v2312_v0  ;;  %v461_v6 = vstv %s2292_s0  ;;  %v458_v8 = vmul.f32 %v457_v3, %v2325_v2  ;;  %v491_v22 = vstv %s2306_s16 }
  0xab   : > { %s2328_s30 = sld [smem:[#allocation8 + $0x82]]  ;;  %v465_v9 = vstv %s2294_s14  ;;  %s476_s4 = smul.f32 %s2298_s28, %s2316_s6  ;;  %v478_v12 = vstv %s474_s29  ;;  %v462_v14 = vmul.f32 %v2336_v5, %v461_v6  ;;  %v488_v25 = vmul.f32 %v2336_v5, %v487_v16 }
  0xac   : > { %s470_s12 = smul.f32 %s2296_s27, %s2283_s24  ;;  %s2333_s1 = sld [smem:[#allocation8 + $0x102]]  ;;  %v479_v15 = vmul.f32 %v478_v12, %v2312_v0  ;;  %v466_v17 = vmul.f32 %v2342_v7, %v465_v9  ;;  %v492_v32 = vmul.f32 %v2342_v7, %v491_v22 }
  0xad   : > { %s451_s26 = ssub.f32 %s448_s15, %s450_s9  ;;  %s2349_s19 = sld [smem:[#allocation13 + $0x2]] }
  0xae   : > { %s496_s0 = smul.f32 %s2309_s5, %s2283_s24  ;;  %s2353_s9 = sld [smem:[#allocation10 + $0x3]]  ;;  %v471_v37 = vstv %s470_s12 }
  0xaf   : > { %v454_v11 = vstv %s451_s26  ;;  %s477_s15 = ssub.f32 %s2300_s22, %s476_s4  ;;  %s501_s14 = smul.f32 %s2318_s7, %s2290_s2 }
  0xb0   : > { %v455_v13 = vadd.f32 %v454_v11, %v453_v4  ;;  %s503_s26 = smul.f32 %s2318_s7, %s2316_s6  ;;  %v510_v19 = vstv %s2322_s20  ;;  %s2366_s29 = sld [smem:[#allocation11 + $0x3]]  ;;  %v497_v49 = vstv %s496_s0 }
  0xb1   : > { %v480_v21 = vstv %s477_s15  ;;  %v505_v23 = vstv %s501_s14  ;;  %s2369_s28 = sld [smem:[#allocation8 + $0x3]]  ;;  %v514_v27 = vstv %s2328_s30  ;;  %v511_v29 = vmul.f32 %v510_v19, %v2325_v2  ;;  %s2388_s16 = sld [smem:[#allocation10 + $0x4]] }
  0xb2   : > { %v459_v20 = vadd.f32 %v458_v8, %v455_v13  ;;  %s2371_s22 = sld [smem:[#allocation8 + $0x83]]  ;;  %v481_v24 = vadd.f32 %v480_v21, %v479_v15  ;;  %s504_s7 = ssub.f32 %s2320_s11, %s503_s26  ;;  %v506_v26 = vmul.f32 %v505_v23, %v2312_v0  ;;  %v518_v30 = vstv %s2333_s1 }
  0xb3   : > { %s2377_s20 = sld [smem:[#allocation8 + $0x103]]  ;;  %s523_s17 = smul.f32 %s2349_s19, %s2283_s24  ;;  %v515_v36 = vmul.f32 %v2336_v5, %v514_v27  ;;  %v519_v39 = vmul.f32 %v2342_v7, %v518_v30 }
  0xb4   : > { %v463_v28 = vadd.f32 %v462_v14, %v459_v20  ;;  %s2383_s21 = sld [smem:[#allocation13 + $0x3]]  ;;  %v485_v31 = vadd.f32 %v484_v18, %v481_v24  ;;  %v507_v33 = vstv %s504_s7  ;;  %s528_s11 = smul.f32 %s2353_s9, %s2290_s2 }
  0xb5   : > { %v508_v35 = vadd.f32 %v507_v33, %v506_v26  ;;  %s530_s30 = smul.f32 %s2353_s9, %s2316_s6  ;;  %s2393_s4 = sld [smem:[#allocation11 + $0x4]]  ;;  %v524_v63 = vstv %s523_s17 }
  0xb6   : > { %v467_v34 = vadd.f32 %v466_v17, %v463_v28  ;;  %v489_v38 = vadd.f32 %v488_v25, %v485_v31  ;;  %v532_v40 = vstv %s528_s11  ;;  %s2399_s1 = sld [smem:[#allocation8 + $0x4]]  ;;  %s2413_s14 = sld [smem:[#allocation10 + $0x5]] }
  0xb7   : > { %s2401_s15 = sld [smem:[#allocation8 + $0x84]]  ;;  %v512_v42 = vadd.f32 %v511_v29, %v508_v35  ;;  %s531_s9 = ssub.f32 %s2366_s29, %s530_s30  ;;  %v533_v43 = vmul.f32 %v532_v40, %v2312_v0  ;;  %v537_v44 = vstv %s2369_s28 }
  0xb8   : > { %v468_v41 = vmax.f32 %v467_v34, 0.0  ;;  %s2406_s12 = sld [smem:[#allocation8 + $0x104]]  ;;  %v493_v45 = vadd.f32 %v492_v32, %v489_v38  ;;  %v538_v46 = vmul.f32 %v537_v44, %v2325_v2  ;;  %v541_v47 = vstv %s2371_s22  ;;  %s2420_s29 = sld [smem:[#allocation11 + $0x5]] }
  0xb9   : > { %v545_v48 = vstv %s2377_s20  ;;  %s2411_s27 = sld [smem:[#allocation13 + $0x4]]  ;;  %v516_v50 = vadd.f32 %v515_v36, %v512_v42  ;;  %v534_v51 = vstv %s531_s9  ;;  %v542_v54 = vmul.f32 %v2336_v5, %v541_v47  ;;  %s555_s28 = smul.f32 %s2388_s16, %s2290_s2 }
  0xba   : > { %s550_s26 = smul.f32 %s2383_s21, %s2283_s24  ;;  %v494_v52 = vmax.f32 %v493_v45, 0.0  ;;  %v535_v53 = vadd.f32 %v534_v51, %v533_v43  ;;  %s2425_s22 = sld [smem:[#allocation8 + $0x5]]  ;;  %v472_v55 = vmul.f32 %v471_v37, %v468_v41  ;;  %v546_v57 = vmul.f32 %v2342_v7, %v545_v48 }
  0xbb   : > { %v520_v56 = vadd.f32 %v519_v39, %v516_v50  ;;  %s557_s5 = smul.f32 %s2388_s16, %s2316_s6  ;;  %s2430_s0 = sld [smem:[#allocation8 + $0x85]]  ;;  %v559_v60 = vstv %s555_s28 }
  0xbc   : > { %v498_v58 = vmul.f32 %v497_v49, %v494_v52  ;;  %v539_v59 = vadd.f32 %v538_v46, %v535_v53  ;;  %v564_v61 = vstv %s2399_s1  ;;  %s2433_s7 = sld [smem:[#allocation8 + $0x105]]  ;;  %v560_v1 = vmul.f32 %v559_v60, %v2312_v0  ;;  %s2443_s16 = sld [smem:[#allocation10 + $0x6]] }
  0xbd   : > { %s2435_s20 = sld [smem:[#allocation13 + $0x5]]  ;;  %v521_v62 = vmax.f32 %v520_v56, 0.0  ;;  %s558_s11 = ssub.f32 %s2393_s4, %s557_s5  ;;  %v568_v3 = vstv %s2401_s15  ;;  %v565_v6 = vmul.f32 %v564_v61, %v2325_v2  ;;  %v551_v22 = vstv %s550_s26 }
  0xbe   : > { %v543_v4 = vadd.f32 %v542_v54, %v539_v59  ;;  %v572_v8 = vstv %s2406_s12  ;;  %s2449_s1 = sld [smem:[#allocation11 + $0x6]]  ;;  %v499_v9 = vadd.f32 %v498_v58, %v472_v55  ;;  %v569_v11 = vmul.f32 %v2336_v5, %v568_v3  ;;  %s582_s19 = smul.f32 %s2413_s14, %s2290_s2 }
  0xbf   : > { %s577_s30 = smul.f32 %s2411_s27, %s2283_s24  ;;  %v561_v10 = vstv %s558_s11  ;;  %s2454_s17 = sld [smem:[#allocation8 + $0x6]]  ;;  %v525_v12 = vmul.f32 %v524_v63, %v521_v62  ;;  %v573_v16 = vmul.f32 %v2342_v7, %v572_v8 }
  0xc0   : > { %v547_v13 = vadd.f32 %v546_v57, %v543_v4  ;;  %v562_v14 = vadd.f32 %v561_v10, %v560_v1  ;;  %s584_s4 = smul.f32 %s2413_s14, %s2316_s6  ;;  %v591_v15 = vstv %s2425_s22  ;;  %s2459_s15 = sld [smem:[#allocation8 + $0x86]]  ;;  %v586_v17 = vstv %s582_s19 }
  0xc1   : > { %s2462_s9 = sld [smem:[#allocation8 + $0x106]]  ;;  %v587_v20 = vmul.f32 %v586_v17, %v2312_v0  ;;  %v595_v21 = vstv %s2430_s0  ;;  %v592_v23 = vmul.f32 %v591_v15, %v2325_v2  ;;  %s2478_s22 = sld [smem:[#allocation10 + $0x7]]  ;;  %v526_v25 = vadd.f32 %v525_v12, %v499_v9 }
  0xc2   : > { %s2464_s12 = sld [smem:[#allocation13 + $0x6]]  ;;  %v548_v18 = vmax.f32 %v547_v13, 0.0  ;;  %v566_v19 = vadd.f32 %v565_v6, %v562_v14  ;;  %s585_s27 = ssub.f32 %s2420_s29, %s584_s4  ;;  %v599_v24 = vstv %s2433_s7  ;;  %v578_v27 = vstv %s577_s30 }
  0xc3   : > { %s604_s14 = smul.f32 %s2435_s20, %s2283_s24  ;;  %s2482_s29 = sld [smem:[#allocation11 + $0x7]]  ;;  %v596_v30 = vmul.f32 %v2336_v5, %v595_v21  ;;  %v600_v35 = vmul.f32 %v2342_v7, %v599_v24 }
  0xc4   : > { %s609_s28 = smul.f32 %s2443_s16, %s2290_s2  ;;  %v570_v26 = vadd.f32 %v569_v11, %v566_v19  ;;  %v588_v28 = vstv %s585_s27  ;;  %s2486_s21 = sld [smem:[#allocation8 + $0x7]]  ;;  %v552_v33 = vmul.f32 %v551_v22, %v548_v18 }
  0xc5   : > { %s611_s5 = smul.f32 %s2443_s16, %s2316_s6  ;;  %v589_v29 = vadd.f32 %v588_v28, %v587_v20  ;;  %v618_v32 = vstv %s2454_s17  ;;  %s2488_s26 = sld [smem:[#allocation8 + $0x87]]  ;;  %v605_v53 = vstv %s604_s14 }
  0xc6   : > { %v613_v31 = vstv %s609_s28  ;;  %v574_v34 = vadd.f32 %v573_v16, %v570_v26  ;;  %s2493_s7 = sld [smem:[#allocation8 + $0x107]]  ;;  %v619_v38 = vmul.f32 %v618_v32, %v2325_v2  ;;  %v622_v39 = vstv %s2459_s15  ;;  %s2502_s30 = sld [smem:[#allocation10 + $0x8]] }
  0xc7   : > { %s612_s0 = ssub.f32 %s2449_s1, %s611_s5  ;;  %v614_v36 = vmul.f32 %v613_v31, %v2312_v0  ;;  %v593_v37 = vadd.f32 %v592_v23, %v589_v29  ;;  %v626_v40 = vstv %s2462_s9  ;;  %s2500_s16 = sld [smem:[#allocation13 + $0x7]]  ;;  %v623_v45 = vmul.f32 %v2336_v5, %v622_v39 }
  0xc8   : > { %s631_s11 = smul.f32 %s2464_s12, %s2283_s24  ;;  %v575_v41 = vmax.f32 %v574_v34, 0.0  ;;  %s2504_s1 = sld [smem:[#allocation11 + $0x8]]  ;;  %v553_v46 = vadd.f32 %v552_v33, %v526_v25  ;;  %v627_v48 = vmul.f32 %v2342_v7, %v626_v40 }
  0xc9   : > { %v615_v42 = vstv %s612_s0  ;;  %v597_v43 = vadd.f32 %v596_v30, %v593_v37  ;;  %s636_s19 = smul.f32 %s2478_s22, %s2290_s2  ;;  %s2509_s17 = sld [smem:[#allocation8 + $0x8]] }
  0xca   : > { %v616_v44 = vadd.f32 %v615_v42, %v614_v36  ;;  %v579_v47 = vmul.f32 %v578_v27, %v575_v41  ;;  %s638_s4 = smul.f32 %s2478_s22, %s2316_s6  ;;  %s2514_s15 = sld [smem:[#allocation8 + $0x88]]  ;;  %v645_v52 = vstv %s2486_s21  ;;  %v632_v13 = vstv %s631_s11 }
  0xcb   : > { %v601_v49 = vadd.f32 %v600_v35, %v597_v43  ;;  %v640_v51 = vstv %s636_s19  ;;  %s2517_s9 = sld [smem:[#allocation8 + $0x108]]  ;;  %v649_v55 = vstv %s2488_s26  ;;  %s2527_s22 = sld [smem:[#allocation10 + $0x9]]  ;;  %v646_v58 = vmul.f32 %v645_v52, %v2325_v2 }
  0xcc   : > { %v620_v50 = vadd.f32 %v619_v38, %v616_v44  ;;  %s2519_s27 = sld [smem:[#allocation13 + $0x8]]  ;;  %s639_s28 = ssub.f32 %s2482_s29, %s638_s4  ;;  %v641_v54 = vmul.f32 %v640_v51, %v2312_v0  ;;  %v653_v59 = vstv %s2493_s7  ;;  %v580_v60 = vadd.f32 %v579_v47, %v553_v46 }
  0xcd   : > { %v602_v56 = vmax.f32 %v601_v49, 0.0  ;;  %s658_s5 = smul.f32 %s2500_s16, %s2283_s24  ;;  %s2533_s21 = sld [smem:[#allocation11 + $0x9]]  ;;  %v650_v3 = vmul.f32 %v2336_v5, %v649_v55  ;;  %v654_v4 = vmul.f32 %v2342_v7, %v653_v59 }
  0xce   : > { %v624_v57 = vadd.f32 %v623_v45, %v620_v50  ;;  %v642_v61 = vstv %s639_s28  ;;  %s663_s20 = smul.f32 %s2502_s30, %s2290_s2  ;;  %s2537_s14 = sld [smem:[#allocation8 + $0x9]] }
  0xcf   : > { %v606_v62 = vmul.f32 %v605_v53, %v602_v56  ;;  %v643_v1 = vadd.f32 %v642_v61, %v641_v54  ;;  %s665_s29 = smul.f32 %s2502_s30, %s2316_s6  ;;  %s2542_s26 = sld [smem:[#allocation8 + $0x89]]  ;;  %v672_v8 = vstv %s2509_s17  ;;  %v659_v18 = vstv %s658_s5 }
  0xd0   : > { %v628_v63 = vadd.f32 %v627_v48, %v624_v57  ;;  %v667_v6 = vstv %s663_s20  ;;  %s2546_s0 = sld [smem:[#allocation8 + $0x109]]  ;;  %v676_v12 = vstv %s2514_s15  ;;  %v673_v14 = vmul.f32 %v672_v8, %v2325_v2  ;;  %s2562_s17 = sld [smem:[#allocation10 + $0xa]] }
  0xd1   : > { %s2548_s7 = sld [smem:[#allocation13 + $0x9]]  ;;  %v647_v10 = vadd.f32 %v646_v58, %v643_v1  ;;  %s666_s16 = ssub.f32 %s2504_s1, %s665_s29  ;;  %v668_v11 = vmul.f32 %v667_v6, %v2312_v0  ;;  %v680_v15 = vstv %s2517_s9  ;;  %v607_v16 = vadd.f32 %v606_v62, %v580_v60 }
  0xd2   : > { %v629_v9 = vmax.f32 %v628_v63, 0.0  ;;  %s685_s30 = smul.f32 %s2519_s27, %s2283_s24  ;;  %s2566_s1 = sld [smem:[#allocation11 + $0xa]]  ;;  %v677_v21 = vmul.f32 %v2336_v5, %v676_v12  ;;  %v681_v26 = vmul.f32 %v2342_v7, %v680_v15 }
  0xd3   : > { %s690_s19 = smul.f32 %s2527_s22, %s2290_s2  ;;  %v651_v17 = vadd.f32 %v650_v3, %v647_v10  ;;  %v669_v19 = vstv %s666_s16  ;;  %s2570_s12 = sld [smem:[#allocation8 + $0xa]] }
  0xd4   : > { %s692_s4 = smul.f32 %s2527_s22, %s2316_s6  ;;  %v670_v20 = vadd.f32 %v669_v19, %v668_v11  ;;  %v699_v23 = vstv %s2537_s14  ;;  %s2572_s11 = sld [smem:[#allocation8 + $0x8a]]  ;;  %v633_v24 = vmul.f32 %v632_v13, %v629_v9  ;;  %v686_v44 = vstv %s685_s30 }
  0xd5   : > { %v694_v22 = vstv %s690_s19  ;;  %v655_v25 = vadd.f32 %v654_v4, %v651_v17  ;;  %s2577_s9 = sld [smem:[#allocation8 + $0x10a]]  ;;  %v700_v29 = vmul.f32 %v699_v23, %v2325_v2  ;;  %v703_v30 = vstv %s2542_s26  ;;  %s2586_s5 = sld [smem:[#allocation10 + $0xb]] }
  0xd6   : > { %s693_s15 = ssub.f32 %s2533_s21, %s692_s4  ;;  %v695_v27 = vmul.f32 %v694_v22, %v2312_v0  ;;  %v674_v28 = vadd.f32 %v673_v14, %v670_v20  ;;  %v707_v31 = vstv %s2546_s0  ;;  %s2584_s22 = sld [smem:[#allocation13 + $0xa]]  ;;  %v704_v36 = vmul.f32 %v2336_v5, %v703_v30 }
  0xd7   : > { %s712_s28 = smul.f32 %s2548_s7, %s2283_s24  ;;  %v656_v32 = vmax.f32 %v655_v25, 0.0  ;;  %s2588_s21 = sld [smem:[#allocation11 + $0xb]]  ;;  %v634_v37 = vadd.f32 %v633_v24, %v607_v16  ;;  %v708_v39 = vmul.f32 %v2342_v7, %v707_v31 }
  0xd8   : > { %v696_v33 = vstv %s693_s15  ;;  %v678_v34 = vadd.f32 %v677_v21, %v674_v28  ;;  %s717_s20 = smul.f32 %s2562_s17, %s2290_s2  ;;  %s2593_s14 = sld [smem:[#allocation8 + $0xb]] }
  0xd9   : > { %v697_v35 = vadd.f32 %v696_v33, %v695_v27  ;;  %v660_v38 = vmul.f32 %v659_v18, %v656_v32  ;;  %s719_s29 = smul.f32 %s2562_s17, %s2316_s6  ;;  %s2598_s26 = sld [smem:[#allocation8 + $0x8b]]  ;;  %v726_v43 = vstv %s2570_s12  ;;  %v713_v1 = vstv %s712_s28 }
  0xda   : > { %v682_v40 = vadd.f32 %v681_v26, %v678_v34  ;;  %v721_v42 = vstv %s717_s20  ;;  %s2601_s0 = sld [smem:[#allocation8 + $0x10b]]  ;;  %v730_v46 = vstv %s2572_s11  ;;  %s2611_s17 = sld [smem:[#allocation10 + $0xc]]  ;;  %v727_v49 = vmul.f32 %v726_v43, %v2325_v2 }
  0xdb   : > { %v701_v41 = vadd.f32 %v700_v29, %v697_v35  ;;  %s2603_s16 = sld [smem:[#allocation13 + $0xb]]  ;;  %s720_s19 = ssub.f32 %s2566_s1, %s719_s29  ;;  %v722_v45 = vmul.f32 %v721_v42, %v2312_v0  ;;  %v734_v50 = vstv %s2577_s9  ;;  %v661_v51 = vadd.f32 %v660_v38, %v634_v37 }
  0xdc   : > { %v683_v47 = vmax.f32 %v682_v40, 0.0  ;;  %s739_s4 = smul.f32 %s2584_s22, %s2283_s24  ;;  %s2617_s12 = sld [smem:[#allocation11 + $0xc]]  ;;  %v731_v56 = vmul.f32 %v2336_v5, %v730_v46  ;;  %v735_v57 = vmul.f32 %v2342_v7, %v734_v50 }
  0xdd   : > { %v705_v48 = vadd.f32 %v704_v36, %v701_v41  ;;  %v723_v52 = vstv %s720_s19  ;;  %s744_s27 = smul.f32 %s2586_s5, %s2290_s2  ;;  %s2621_s30 = sld [smem:[#allocation8 + $0xc]] }
  0xde   : > { %v687_v53 = vmul.f32 %v686_v44, %v683_v47  ;;  %v724_v55 = vadd.f32 %v723_v52, %v722_v45  ;;  %s746_s1 = smul.f32 %s2586_s5, %s2316_s6  ;;  %s2626_s11 = sld [smem:[#allocation8 + $0x8c]]  ;;  %v753_v59 = vstv %s2593_s14  ;;  %v740_v9 = vstv %s739_s4 }
  0xdf   : > { %v709_v54 = vadd.f32 %v708_v39, %v705_v48  ;;  %v748_v58 = vstv %s744_s27  ;;  %s2630_s15 = sld [smem:[#allocation8 + $0x10c]]  ;;  %v757_v63 = vstv %s2598_s26  ;;  %v754_v3 = vmul.f32 %v753_v59, %v2325_v2  ;;  %s2646_s14 = sld [smem:[#allocation10 + $0xd]] }
  0xe0   : > { %s2632_s9 = sld [smem:[#allocation13 + $0xc]]  ;;  %v728_v61 = vadd.f32 %v727_v49, %v724_v55  ;;  %s747_s22 = ssub.f32 %s2588_s21, %s746_s1  ;;  %v749_v62 = vmul.f32 %v748_v58, %v2312_v0  ;;  %v761_v4 = vstv %s2601_s0  ;;  %v688_v6 = vadd.f32 %v687_v53, %v661_v51 }
  0xe1   : > { %v710_v60 = vmax.f32 %v709_v54, 0.0  ;;  %s766_s5 = smul.f32 %s2603_s16, %s2283_s24  ;;  %s2650_s21 = sld [smem:[#allocation11 + $0xd]]  ;;  %v758_v12 = vmul.f32 %v2336_v5, %v757_v63  ;;  %v762_v17 = vmul.f32 %v2342_v7, %v761_v4 }
  0xe2   : > { %s771_s20 = smul.f32 %s2611_s17, %s2290_s2  ;;  %v732_v8 = vadd.f32 %v731_v56, %v728_v61  ;;  %v750_v10 = vstv %s747_s22  ;;  %s2654_s7 = sld [smem:[#allocation8 + $0xd]] }
  0xe3   : > { %s773_s29 = smul.f32 %s2611_s17, %s2316_s6  ;;  %v751_v11 = vadd.f32 %v750_v10, %v749_v62  ;;  %v780_v14 = vstv %s2621_s30  ;;  %s2656_s28 = sld [smem:[#allocation8 + $0x8d]]  ;;  %v714_v15 = vmul.f32 %v713_v1, %v710_v60  ;;  %v767_v35 = vstv %s766_s5 }
  0xe4   : > { %v775_v13 = vstv %s771_s20  ;;  %v736_v16 = vadd.f32 %v735_v57, %v732_v8  ;;  %s2661_s0 = sld [smem:[#allocation8 + $0x10d]]  ;;  %v781_v20 = vmul.f32 %v780_v14, %v2325_v2  ;;  %v784_v21 = vstv %s2626_s11  ;;  %s2670_s4 = sld [smem:[#allocation10 + $0xe]] }
  0xe5   : > { %s774_s26 = ssub.f32 %s2617_s12, %s773_s29  ;;  %v776_v18 = vmul.f32 %v775_v13, %v2312_v0  ;;  %v755_v19 = vadd.f32 %v754_v3, %v751_v11  ;;  %v788_v22 = vstv %s2630_s15  ;;  %s2668_s17 = sld [smem:[#allocation13 + $0xd]]  ;;  %v785_v27 = vmul.f32 %v2336_v5, %v784_v21 }
  0xe6   : > { %s793_s19 = smul.f32 %s2632_s9, %s2283_s24  ;;  %v737_v23 = vmax.f32 %v736_v16, 0.0  ;;  %s2672_s12 = sld [smem:[#allocation11 + $0xe]]  ;;  %v715_v28 = vadd.f32 %v714_v15, %v688_v6  ;;  %v789_v30 = vmul.f32 %v2342_v7, %v788_v22 }
  0xe7   : > { %v777_v24 = vstv %s774_s26  ;;  %v759_v25 = vadd.f32 %v758_v12, %v755_v19  ;;  %s798_s27 = smul.f32 %s2646_s14, %s2290_s2  ;;  %s2677_s30 = sld [smem:[#allocation8 + $0xe]] }
  0xe8   : > { %v778_v26 = vadd.f32 %v777_v24, %v776_v18  ;;  %v741_v29 = vmul.f32 %v740_v9, %v737_v23  ;;  %s800_s1 = smul.f32 %s2646_s14, %s2316_s6  ;;  %s2682_s11 = sld [smem:[#allocation8 + $0x8e]]  ;;  %v807_v34 = vstv %s2654_s7  ;;  %v794_v55 = vstv %s793_s19 }
  0xe9   : > { %v763_v31 = vadd.f32 %v762_v17, %v759_v25  ;;  %v802_v33 = vstv %s798_s27  ;;  %s2685_s15 = sld [smem:[#allocation8 + $0x10e]]  ;;  %v811_v37 = vstv %s2656_s28  ;;  %s2695_s14 = sld [smem:[#allocation10 + $0xf]]  ;;  %v808_v40 = vmul.f32 %v807_v34, %v2325_v2 }
  0xea   : > { %v782_v32 = vadd.f32 %v781_v20, %v778_v26  ;;  %s2687_s22 = sld [smem:[#allocation13 + $0xe]]  ;;  %s801_s20 = ssub.f32 %s2650_s21, %s800_s1  ;;  %v803_v36 = vmul.f32 %v802_v33, %v2312_v0  ;;  %v815_v41 = vstv %s2661_s0  ;;  %v742_v42 = vadd.f32 %v741_v29, %v715_v28 }
  0xeb   : > { %v764_v38 = vmax.f32 %v763_v31, 0.0  ;;  %s820_s29 = smul.f32 %s2668_s17, %s2283_s24  ;;  %s2701_s7 = sld [smem:[#allocation11 + $0xf]]  ;;  %v812_v47 = vmul.f32 %v2336_v5, %v811_v37  ;;  %v816_v48 = vmul.f32 %v2342_v7, %v815_v41 }
  0xec   : > { %v786_v39 = vadd.f32 %v785_v27, %v782_v32  ;;  %v804_v43 = vstv %s801_s20  ;;  %s825_s16 = smul.f32 %s2670_s4, %s2290_s2  ;;  %s2705_s5 = sld [smem:[#allocation8 + $0xf]] }
  0xed   : > { %v768_v44 = vmul.f32 %v767_v35, %v764_v38  ;;  %v805_v46 = vadd.f32 %v804_v43, %v803_v36  ;;  %s827_s21 = smul.f32 %s2670_s4, %s2316_s6  ;;  %s2710_s28 = sld [smem:[#allocation8 + $0x8f]]  ;;  %v834_v50 = vstv %s2677_s30  ;;  %v821_v60 = vstv %s820_s29 }
  0xee   : > { %v790_v45 = vadd.f32 %v789_v30, %v786_v39  ;;  %v829_v49 = vstv %s825_s16  ;;  %s2714_s26 = sld [smem:[#allocation8 + $0x10f]]  ;;  %v838_v54 = vstv %s2682_s11  ;;  %v835_v56 = vmul.f32 %v834_v50, %v2325_v2  ;;  %s2730_s30 = sld [smem:[#allocation10 + $0x10]] }
  0xef   : > { %s2716_s0 = sld [smem:[#allocation13 + $0xf]]  ;;  %v809_v52 = vadd.f32 %v808_v40, %v805_v46  ;;  %s828_s17 = ssub.f32 %s2672_s12, %s827_s21  ;;  %v830_v53 = vmul.f32 %v829_v49, %v2312_v0  ;;  %v842_v57 = vstv %s2685_s15  ;;  %v769_v58 = vadd.f32 %v768_v44, %v742_v42 }
  0xf0   : > { %v791_v51 = vmax.f32 %v790_v45, 0.0  ;;  %s847_s4 = smul.f32 %s2687_s22, %s2283_s24  ;;  %s2734_s12 = sld [smem:[#allocation11 + $0x10]]  ;;  %v839_v63 = vmul.f32 %v2336_v5, %v838_v54  ;;  %v843_v8 = vmul.f32 %v2342_v7, %v842_v57 }
  0xf1   : > { %s852_s27 = smul.f32 %s2695_s14, %s2290_s2  ;;  %v813_v59 = vadd.f32 %v812_v47, %v809_v52  ;;  %v831_v61 = vstv %s828_s17  ;;  %s2738_s9 = sld [smem:[#allocation8 + $0x10]] }
  0xf2   : > { %s854_s1 = smul.f32 %s2695_s14, %s2316_s6  ;;  %v832_v62 = vadd.f32 %v831_v61, %v830_v53  ;;  %v861_v3 = vstv %s2705_s5  ;;  %s2740_s19 = sld [smem:[#allocation8 + $0x90]]  ;;  %v795_v4 = vmul.f32 %v794_v55, %v791_v51  ;;  %v848_v26 = vstv %s847_s4 }
  0xf3   : > { %v856_v1 = vstv %s852_s27  ;;  %v817_v6 = vadd.f32 %v816_v48, %v813_v59  ;;  %s2745_s15 = sld [smem:[#allocation8 + $0x110]]  ;;  %v862_v11 = vmul.f32 %v861_v3, %v2325_v2  ;;  %v865_v12 = vstv %s2710_s28  ;;  %s2754_s29 = sld [smem:[#allocation10 + $0x11]] }
  0xf4   : > { %s855_s11 = ssub.f32 %s2701_s7, %s854_s1  ;;  %v857_v9 = vmul.f32 %v856_v1, %v2312_v0  ;;  %v836_v10 = vadd.f32 %v835_v56, %v832_v62  ;;  %v869_v13 = vstv %s2714_s26  ;;  %s2752_s14 = sld [smem:[#allocation13 + $0x10]]  ;;  %v866_v18 = vmul.f32 %v2336_v5, %v865_v12 }
  0xf5   : > { %s874_s20 = smul.f32 %s2716_s0, %s2283_s24  ;;  %v818_v14 = vmax.f32 %v817_v6, 0.0  ;;  %s2756_s7 = sld [smem:[#allocation11 + $0x11]]  ;;  %v796_v19 = vadd.f32 %v795_v4, %v769_v58  ;;  %v870_v21 = vmul.f32 %v2342_v7, %v869_v13 }
  0xf6   : > { %v858_v15 = vstv %s855_s11  ;;  %v840_v16 = vadd.f32 %v839_v63, %v836_v10  ;;  %s879_s16 = smul.f32 %s2730_s30, %s2290_s2  ;;  %s2761_s5 = sld [smem:[#allocation8 + $0x11]] }
  0xf7   : > { %v859_v17 = vadd.f32 %v858_v15, %v857_v9  ;;  %v822_v20 = vmul.f32 %v821_v60, %v818_v14  ;;  %s881_s21 = smul.f32 %s2730_s30, %s2316_s6  ;;  %s2766_s28 = sld [smem:[#allocation8 + $0x91]]  ;;  %v888_v25 = vstv %s2738_s9  ;;  %v875_v46 = vstv %s874_s20 }
  0xf8   : > { %v844_v22 = vadd.f32 %v843_v8, %v840_v16  ;;  %v883_v24 = vstv %s879_s16  ;;  %s2769_s26 = sld [smem:[#allocation8 + $0x111]]  ;;  %v892_v28 = vstv %s2740_s19  ;;  %s2779_s30 = sld [smem:[#allocation10 + $0x12]]  ;;  %v889_v31 = vmul.f32 %v888_v25, %v2325_v2 }
  0xf9   : > { %v863_v23 = vadd.f32 %v862_v11, %v859_v17  ;;  %s2771_s17 = sld [smem:[#allocation13 + $0x11]]  ;;  %s882_s27 = ssub.f32 %s2734_s12, %s881_s21  ;;  %v884_v27 = vmul.f32 %v883_v24, %v2312_v0  ;;  %v896_v32 = vstv %s2745_s15  ;;  %v823_v33 = vadd.f32 %v822_v20, %v796_v19 }
  0xfa   : > { %v845_v29 = vmax.f32 %v844_v22, 0.0  ;;  %s901_s1 = smul.f32 %s2752_s14, %s2283_s24  ;;  %s2785_s9 = sld [smem:[#allocation11 + $0x12]]  ;;  %v893_v38 = vmul.f32 %v2336_v5, %v892_v28  ;;  %v897_v39 = vmul.f32 %v2342_v7, %v896_v32 }
  0xfb   : > { %v867_v30 = vadd.f32 %v866_v18, %v863_v23  ;;  %v885_v34 = vstv %s882_s27  ;;  %s906_s22 = smul.f32 %s2754_s29, %s2290_s2  ;;  %s2789_s4 = sld [smem:[#allocation8 + $0x12]] }
  0xfc   : > { %v849_v35 = vmul.f32 %v848_v26, %v845_v29  ;;  %v886_v37 = vadd.f32 %v885_v34, %v884_v27  ;;  %s908_s12 = smul.f32 %s2754_s29, %s2316_s6  ;;  %s2794_s19 = sld [smem:[#allocation8 + $0x92]]  ;;  %v915_v41 = vstv %s2761_s5  ;;  %v902_v51 = vstv %s901_s1  ;;  %v2876_v26 = vld [vmem:[%s2260_s23 + $0x2] sm:$0x3]  ;;  %v2884_v27 = vld [vmem:[%s2260_s23 + $0x4] sm:$0x3] }
  0xfd   : > { %v871_v36 = vadd.f32 %v870_v21, %v867_v30  ;;  %v910_v40 = vstv %s906_s22  ;;  %s2798_s11 = sld [smem:[#allocation8 + $0x112]]  ;;  %v919_v45 = vstv %s2766_s28  ;;  %v916_v47 = vmul.f32 %v915_v41, %v2325_v2  ;;  %s2814_s5 = sld [smem:[#allocation10 + $0x13]] }
  0xfe   : > { %s2800_s15 = sld [smem:[#allocation13 + $0x12]]  ;;  %v890_v43 = vadd.f32 %v889_v31, %v886_v37  ;;  %s909_s14 = ssub.f32 %s2756_s7, %s908_s12  ;;  %v911_v44 = vmul.f32 %v910_v40, %v2312_v0  ;;  %v923_v48 = vstv %s2769_s26  ;;  %v850_v49 = vadd.f32 %v849_v35, %v823_v33  ;;  %v2894_v33 = vld [vmem:[%s2288_s3] sm:$0x3] }
  0xff   : > { %v872_v42 = vmax.f32 %v871_v36, 0.0  ;;  %s928_s29 = smul.f32 %s2771_s17, %s2283_s24  ;;  %s2818_s7 = sld [smem:[#allocation11 + $0x13]]  ;;  %v920_v54 = vmul.f32 %v2336_v5, %v919_v45  ;;  %v924_v59 = vmul.f32 %v2342_v7, %v923_v48  ;;  %v2904_v37 = vld [vmem:[%s2260_s23] sm:$0x3] }
 0x100   : > { %s933_s16 = smul.f32 %s2779_s30, %s2290_s2  ;;  %v894_v50 = vadd.f32 %v893_v38, %v890_v43  ;;  %v912_v52 = vstv %s909_s14  ;;  %s2822_s0 = sld [smem:[#allocation8 + $0x13]] }
 0x101   : > { %s935_s21 = smul.f32 %s2779_s30, %s2316_s6  ;;  %v913_v53 = vadd.f32 %v912_v52, %v911_v44  ;;  %v942_v56 = vstv %s2789_s4  ;;  %s2824_s20 = sld [smem:[#allocation8 + $0x93]]  ;;  %v876_v57 = vmul.f32 %v875_v46, %v872_v42 }
 0x102   : > { %v937_v55 = vstv %s933_s16  ;;  %v898_v58 = vadd.f32 %v897_v39, %v894_v50  ;;  %s2829_s26 = sld [smem:[#allocation8 + $0x113]]  ;;  %v943_v62 = vmul.f32 %v942_v56, %v2325_v2  ;;  %v946_v63 = vstv %s2794_s19  ;;  %s2838_s1 = sld [smem:[#allocation10 + $0x14]] }
 0x103   : > { %s936_s28 = ssub.f32 %s2785_s9, %s935_s21  ;;  %v938_v60 = vmul.f32 %v937_v55, %v2312_v0  ;;  %v917_v61 = vadd.f32 %v916_v47, %v913_v53  ;;  %v950_v1 = vstv %s2798_s11  ;;  %s2836_s30 = sld [smem:[#allocation13 + $0x13]]  ;;  %v947_v9 = vmul.f32 %v2336_v5, %v946_v63 }
 0x104   : > { %s955_s27 = smul.f32 %s2800_s15, %s2283_s24  ;;  %v899_v3 = vmax.f32 %v898_v58, 0.0  ;;  %s2840_s9 = sld [smem:[#allocation11 + $0x14]]  ;;  %v877_v10 = vadd.f32 %v876_v57, %v850_v49  ;;  %v951_v12 = vmul.f32 %v2342_v7, %v950_v1  ;;  %v929_v5 = vstv %s928_s29 }
 0x105   : > { %v939_v4 = vstv %s936_s28  ;;  %v921_v6 = vadd.f32 %v920_v54, %v917_v61  ;;  %s960_s22 = smul.f32 %s2814_s5, %s2290_s2  ;;  %s2845_s4 = sld [smem:[#allocation8 + $0x14]] }
 0x106   : > { %v940_v8 = vadd.f32 %v939_v4, %v938_v60  ;;  %v903_v11 = vmul.f32 %v902_v51, %v899_v3  ;;  %s962_s12 = smul.f32 %s2814_s5, %s2316_s6  ;;  %s2850_s19 = sld [smem:[#allocation8 + $0x94]]  ;;  %v969_v16 = vstv %s2822_s0  ;;  %v956_v36 = vstv %s955_s27 }
 0x107   : > { %v925_v13 = vadd.f32 %v924_v59, %v921_v6  ;;  %v964_v15 = vstv %s960_s22  ;;  %s2853_s11 = sld [smem:[#allocation8 + $0x114]]  ;;  %v973_v17 = vstv %s2824_s20  ;;  %s2863_s5 = sld [smem:[#allocation10 + $0x15]]  ;;  %v970_v20 = vmul.f32 %v969_v16, %v2325_v2 }
 0x108   : > { %v944_v14 = vadd.f32 %v943_v62, %v940_v8  ;;  %s2855_s14 = sld [smem:[#allocation13 + $0x14]]  ;;  %s963_s16 = ssub.f32 %s2818_s7, %s962_s12  ;;  %v965_v7 = vmul.f32 %v964_v15, %v2312_v0  ;;  %v977_v21 = vstv %s2829_s26  ;;  %v904_v22 = vadd.f32 %v903_v11, %v877_v10 }
 0x109   : > { %v926_v18 = vmax.f32 %v925_v13, 0.0  ;;  %s982_s21 = smul.f32 %s2836_s30, %s2283_s24  ;;  %s2869_s0 = sld [smem:[#allocation11 + $0x15]]  ;;  %v974_v2 = vmul.f32 %v2876_v26, %v973_v17  ;;  %v978_v28 = vmul.f32 %v2884_v27, %v977_v21 }
 0x10a   : > { %v948_v19 = vadd.f32 %v947_v9, %v944_v14  ;;  %v966_v23 = vstv %s963_s16  ;;  %s987_s17 = smul.f32 %s2838_s1, %s2290_s2  ;;  %s2873_s29 = sld [smem:[#allocation8 + $0x15]] }
 0x10b   : > { %v930_v0 = vmul.f32 %v929_v5, %v926_v18  ;;  %v967_v25 = vadd.f32 %v966_v23, %v965_v7  ;;  %s989_s7 = smul.f32 %s2838_s1, %s2316_s6  ;;  %s2881_s20 = sld [smem:[#allocation8 + $0x95]]  ;;  %v996_v30 = vstv %s2845_s4  ;;  %v983_v42 = vstv %s982_s21 }
 0x10c   : > { %v952_v24 = vadd.f32 %v951_v12, %v948_v19  ;;  %v991_v29 = vstv %s987_s17  ;;  %s2888_s28 = sld [smem:[#allocation8 + $0x115]]  ;;  %v1000_v35 = vstv %s2850_s19  ;;  %v997_v38 = vmul.f32 %v2904_v37, %v996_v30  ;;  %s2910_s12 = sld [smem:[#allocation10 + $0x16]] }
 0x10d   : > { %s2890_s26 = sld [smem:[#allocation13 + $0x15]]  ;;  %v971_v32 = vadd.f32 %v970_v20, %v967_v25  ;;  %s990_s1 = ssub.f32 %s2840_s9, %s989_s7  ;;  %v992_v34 = vmul.f32 %v2894_v33, %v991_v29  ;;  %v1004_v39 = vstv %s2853_s11  ;;  %v931_v40 = vadd.f32 %v930_v0, %v904_v22 }
 0x10e   : > { %v953_v31 = vmax.f32 %v952_v24, 0.0  ;;  %s1009_s22 = smul.f32 %s2855_s14, %s2283_s24  ;;  %s2917_s9 = sld [smem:[#allocation11 + $0x16]]  ;;  %v1001_v45 = vmul.f32 %v2876_v26, %v1000_v35  ;;  %v1005_v50 = vmul.f32 %v2884_v27, %v1004_v39 }
 0x10f   : > { %s1014_s4 = smul.f32 %s2863_s5, %s2290_s2  ;;  %v975_v41 = vadd.f32 %v974_v2, %v971_v32  ;;  %v993_v43 = vstv %s990_s1  ;;  %s2921_s23 = sld [smem:[#allocation8 + $0x16]] }
 0x110   : > { %s1016_s3 = smul.f32 %s2863_s5, %s2316_s6  ;;  %v994_v44 = vadd.f32 %v993_v43, %v992_v34  ;;  %v1023_v47 = vstv %s2873_s29  ;;  %s2923_s15 = sld [smem:[#allocation8 + $0x96]]  ;;  %v957_v48 = vmul.f32 %v956_v36, %v953_v31  ;;  %v1010_v8 = vstv %s1009_s22 }
 0x111   : > { %v1018_v46 = vstv %s1014_s4  ;;  %v979_v49 = vadd.f32 %v978_v28, %v975_v41  ;;  %s2928_s30 = sld [smem:[#allocation8 + $0x116]]  ;;  %v1024_v53 = vmul.f32 %v2904_v37, %v1023_v47  ;;  %v1027_v54 = vstv %s2881_s20  ;;  %s2937_s16 = sld [smem:[#allocation10 + $0x17]] }
 0x112   : > { %s1017_s27 = ssub.f32 %s2869_s0, %s1016_s3  ;;  %v1019_v51 = vmul.f32 %v2894_v33, %v1018_v46  ;;  %v998_v52 = vadd.f32 %v997_v38, %v994_v44  ;;  %v1031_v55 = vstv %s2888_s28  ;;  %s2935_s11 = sld [smem:[#allocation13 + $0x16]]  ;;  %v1028_v60 = vmul.f32 %v2876_v26, %v1027_v54 }
 0x113   : > { %s1036_s19 = smul.f32 %s2890_s26, %s2283_s24  ;;  %v980_v56 = vmax.f32 %v979_v49, 0.0  ;;  %s2939_s5 = sld [smem:[#allocation11 + $0x17]]  ;;  %v958_v61 = vadd.f32 %v957_v48, %v931_v40  ;;  %v1032_v63 = vmul.f32 %v2884_v27, %v1031_v55 }
 0x114   : > { %v1020_v57 = vstv %s1017_s27  ;;  %v1002_v58 = vadd.f32 %v1001_v45, %v998_v52  ;;  %s1041_s21 = smul.f32 %s2910_s12, %s2290_s2  ;;  %s2944_s0 = sld [smem:[#allocation8 + $0x17]] }
 0x115   : > { %v1021_v59 = vadd.f32 %v1020_v57, %v1019_v51  ;;  %v984_v62 = vmul.f32 %v983_v42, %v980_v56  ;;  %s1043_s17 = smul.f32 %s2910_s12, %s2316_s6  ;;  %s2949_s29 = sld [smem:[#allocation8 + $0x97]]  ;;  %v1050_v6 = vstv %s2921_s23  ;;  %v1037_v25 = vstv %s1036_s19 }
 0x116   : > { %v1006_v1 = vadd.f32 %v1005_v50, %v1002_v58  ;;  %v1045_v4 = vstv %s1041_s21  ;;  %s2952_s7 = sld [smem:[#allocation8 + $0x117]]  ;;  %v1054_v10 = vstv %s2923_s15  ;;  %s2962_s1 = sld [smem:[#allocation10 + $0x18]]  ;;  %v1051_v13 = vmul.f32 %v2904_v37, %v1050_v6 }
 0x117   : > { %v1025_v3 = vadd.f32 %v1024_v53, %v1021_v59  ;;  %s2954_s20 = sld [smem:[#allocation13 + $0x17]]  ;;  %s1044_s28 = ssub.f32 %s2917_s9, %s1043_s17  ;;  %v1046_v9 = vmul.f32 %v2894_v33, %v1045_v4  ;;  %v1058_v14 = vstv %s2928_s30  ;;  %v985_v15 = vadd.f32 %v984_v62, %v958_v61 }
 0x118   : > { %v1007_v11 = vmax.f32 %v1006_v1, 0.0  ;;  %s1063_s4 = smul.f32 %s2935_s11, %s2283_s24  ;;  %s2968_s12 = sld [smem:[#allocation11 + $0x18]]  ;;  %v1055_v18 = vmul.f32 %v2876_v26, %v1054_v10  ;;  %v1059_v19 = vmul.f32 %v2884_v27, %v1058_v14 }
 0x119   : > { %v1029_v12 = vadd.f32 %v1028_v60, %v1025_v3  ;;  %v1047_v16 = vstv %s1044_s28  ;;  %s1068_s14 = smul.f32 %s2937_s16, %s2290_s2  ;;  %s2972_s22 = sld [smem:[#allocation8 + $0x18]] }
 0x11a   : > { %v1011_v5 = vmul.f32 %v1010_v8, %v1007_v11  ;;  %v1048_v17 = vadd.f32 %v1047_v16, %v1046_v9  ;;  %s1070_s3 = smul.f32 %s2937_s16, %s2316_s6  ;;  %s2977_s9 = sld [smem:[#allocation8 + $0x98]]  ;;  %v1077_v21 = vstv %s2944_s0  ;;  %v1064_v31 = vstv %s1063_s4 }
 0x11b   : > { %v1033_v7 = vadd.f32 %v1032_v63, %v1029_v12  ;;  %v1072_v20 = vstv %s1068_s14  ;;  %s2981_s23 = sld [smem:[#allocation8 + $0x118]]  ;;  %v1081_v24 = vstv %s2949_s29  ;;  %v1078_v2 = vmul.f32 %v2904_v37, %v1077_v21  ;;  %s2997_s16 = sld [smem:[#allocation10 + $0x19]] }
 0x11c   : > { %s2983_s15 = sld [smem:[#allocation13 + $0x18]]  ;;  %v1052_v23 = vadd.f32 %v1051_v13, %v1048_v17  ;;  %s1071_s27 = ssub.f32 %s2939_s5, %s1070_s3  ;;  %v1073_v0 = vmul.f32 %v2894_v33, %v1072_v20  ;;  %v1085_v28 = vstv %s2952_s7  ;;  %v1012_v29 = vadd.f32 %v1011_v5, %v985_v15 }
 0x11d   : > { %v1034_v22 = vmax.f32 %v1033_v7, 0.0  ;;  %s1090_s30 = smul.f32 %s2954_s20, %s2283_s24  ;;  %s3001_s5 = sld [smem:[#allocation11 + $0x19]]  ;;  %v1082_v35 = vmul.f32 %v2876_v26, %v1081_v24  ;;  %v1086_v41 = vmul.f32 %v2884_v27, %v1085_v28 }
 0x11e   : > { %s1095_s11 = smul.f32 %s2962_s1, %s2290_s2  ;;  %v1056_v30 = vadd.f32 %v1055_v18, %v1052_v23  ;;  %v1074_v32 = vstv %s1071_s27  ;;  %s3005_s26 = sld [smem:[#allocation8 + $0x19]] }
 0x11f   : > { %s1097_s21 = smul.f32 %s2962_s1, %s2316_s6  ;;  %v1075_v34 = vadd.f32 %v1074_v32, %v1073_v0  ;;  %v1104_v38 = vstv %s2972_s22  ;;  %s3007_s19 = sld [smem:[#allocation8 + $0x99]]  ;;  %v1038_v39 = vmul.f32 %v1037_v25, %v1034_v22  ;;  %v1091_v59 = vstv %s1090_s30 }
 0x120   : > { %v1099_v36 = vstv %s1095_s11  ;;  %v1060_v40 = vadd.f32 %v1059_v19, %v1056_v30  ;;  %s3012_s17 = sld [smem:[#allocation8 + $0x119]]  ;;  %v1105_v44 = vmul.f32 %v2904_v37, %v1104_v38  ;;  %v1108_v45 = vstv %s2977_s9  ;;  %s3021_s28 = sld [smem:[#allocation10 + $0x1a]] }
 0x121   : > { %s1098_s0 = ssub.f32 %s2968_s12, %s1097_s21  ;;  %v1100_v42 = vmul.f32 %v2894_v33, %v1099_v36  ;;  %v1079_v43 = vadd.f32 %v1078_v2, %v1075_v34  ;;  %v1112_v46 = vstv %s2981_s23  ;;  %s3019_s7 = sld [smem:[#allocation13 + $0x19]]  ;;  %v1109_v51 = vmul.f32 %v2876_v26, %v1108_v45 }
 0x122   : > { %s1117_s29 = smul.f32 %s2983_s15, %s2283_s24  ;;  %v1061_v47 = vmax.f32 %v1060_v40, 0.0  ;;  %s3023_s1 = sld [smem:[#allocation11 + $0x1a]]  ;;  %v1039_v52 = vadd.f32 %v1038_v39, %v1012_v29  ;;  %v1113_v54 = vmul.f32 %v2884_v27, %v1112_v46 }
 0x123   : > { %v1101_v48 = vstv %s1098_s0  ;;  %v1083_v49 = vadd.f32 %v1082_v35, %v1079_v43  ;;  %s1122_s4 = smul.f32 %s2997_s16, %s2290_s2  ;;  %s3028_s12 = sld [smem:[#allocation8 + $0x1a]] }
 0x124   : > { %v1102_v50 = vadd.f32 %v1101_v48, %v1100_v42  ;;  %v1065_v53 = vmul.f32 %v1064_v31, %v1061_v47  ;;  %s1124_s14 = smul.f32 %s2997_s16, %s2316_s6  ;;  %s3033_s22 = sld [smem:[#allocation8 + $0x9a]]  ;;  %v1131_v58 = vstv %s3005_s26  ;;  %v1118_v17 = vstv %s1117_s29 }
 0x125   : > { %v1087_v55 = vadd.f32 %v1086_v41, %v1083_v49  ;;  %v1126_v57 = vstv %s1122_s4  ;;  %s3036_s3 = sld [smem:[#allocation8 + $0x11a]]  ;;  %v1135_v61 = vstv %s3007_s19  ;;  %s3046_s27 = sld [smem:[#allocation10 + $0x1b]]  ;;  %v1132_v1 = vmul.f32 %v2904_v37, %v1131_v58 }
 0x126   : > { %v1106_v56 = vadd.f32 %v1105_v44, %v1102_v50  ;;  %s3038_s9 = sld [smem:[#allocation13 + $0x1a]]  ;;  %s1125_s23 = ssub.f32 %s3001_s5, %s1124_s14  ;;  %v1127_v60 = vmul.f32 %v2894_v33, %v1126_v57  ;;  %v1139_v3 = vstv %s3012_s17  ;;  %v1066_v4 = vadd.f32 %v1065_v53, %v1039_v52 }
 0x127   : > { %v1088_v62 = vmax.f32 %v1087_v55, 0.0  ;;  %s1144_s11 = smul.f32 %s3019_s7, %s2283_s24  ;;  %s3052_s16 = sld [smem:[#allocation11 + $0x1b]]  ;;  %v1136_v11 = vmul.f32 %v2876_v26, %v1135_v61  ;;  %v1140_v12 = vmul.f32 %v2884_v27, %v1139_v3 }
 0x128   : > { %v1110_v63 = vadd.f32 %v1109_v51, %v1106_v56  ;;  %v1128_v6 = vstv %s1125_s23  ;;  %s1149_s20 = smul.f32 %s3021_s28, %s2290_s2  ;;  %s3056_s30 = sld [smem:[#allocation8 + $0x1b]] }
 0x129   : > { %v1092_v8 = vmul.f32 %v1091_v59, %v1088_v62  ;;  %v1129_v10 = vadd.f32 %v1128_v6, %v1127_v60  ;;  %s1151_s21 = smul.f32 %s3021_s28, %s2316_s6  ;;  %s3061_s5 = sld [smem:[#allocation8 + $0x9b]]  ;;  %v1158_v14 = vstv %s3028_s12  ;;  %v1145_v22 = vstv %s1144_s11 }
 0x12a   : > { %v1114_v9 = vadd.f32 %v1113_v54, %v1110_v63  ;;  %v1153_v13 = vstv %s1149_s20  ;;  %s3065_s26 = sld [smem:[#allocation8 + $0x11b]]  ;;  %v1162_v7 = vstv %s3033_s22  ;;  %v1159_v18 = vmul.f32 %v2904_v37, %v1158_v14  ;;  %s3081_s28 = sld [smem:[#allocation10 + $0x1c]] }
 0x12b   : > { %s3067_s19 = sld [smem:[#allocation13 + $0x1b]]  ;;  %v1133_v16 = vadd.f32 %v1132_v1, %v1129_v10  ;;  %s1152_s0 = ssub.f32 %s3023_s1, %s1151_s21  ;;  %v1154_v5 = vmul.f32 %v2894_v33, %v1153_v13  ;;  %v1166_v19 = vstv %s3036_s3  ;;  %v1093_v20 = vadd.f32 %v1092_v8, %v1066_v4 }
 0x12c   : > { %v1115_v15 = vmax.f32 %v1114_v9, 0.0  ;;  %s1171_s17 = smul.f32 %s3038_s9, %s2283_s24  ;;  %s3085_s1 = sld [smem:[#allocation11 + $0x1c]]  ;;  %v1163_v24 = vmul.f32 %v2876_v26, %v1162_v7  ;;  %v1167_v30 = vmul.f32 %v2884_v27, %v1166_v19 }
 0x12d   : > { %s1176_s7 = smul.f32 %s3046_s27, %s2290_s2  ;;  %v1137_v21 = vadd.f32 %v1136_v11, %v1133_v16  ;;  %v1155_v23 = vstv %s1152_s0  ;;  %s3089_s15 = sld [smem:[#allocation8 + $0x1c]] }
 0x12e   : > { %s1178_s4 = smul.f32 %s3046_s27, %s2316_s6  ;;  %v1156_v0 = vadd.f32 %v1155_v23, %v1154_v5  ;;  %v1185_v2 = vstv %s3056_s30  ;;  %s3091_s29 = sld [smem:[#allocation8 + $0x9c]]  ;;  %v1119_v28 = vmul.f32 %v1118_v17, %v1115_v15  ;;  %v1172_v50 = vstv %s1171_s17 }
 0x12f   : > { %v1180_v25 = vstv %s1176_s7  ;;  %v1141_v29 = vadd.f32 %v1140_v12, %v1137_v21  ;;  %s3096_s14 = sld [smem:[#allocation8 + $0x11c]]  ;;  %v1186_v34 = vmul.f32 %v2904_v37, %v1185_v2  ;;  %v1189_v35 = vstv %s3061_s5  ;;  %s3105_s23 = sld [smem:[#allocation10 + $0x1d]] }
 0x130   : > { %s1179_s12 = ssub.f32 %s3052_s16, %s1178_s4  ;;  %v1181_v31 = vmul.f32 %v2894_v33, %v1180_v25  ;;  %v1160_v32 = vadd.f32 %v1159_v18, %v1156_v0  ;;  %v1193_v36 = vstv %s3065_s26  ;;  %s3103_s3 = sld [smem:[#allocation13 + $0x1c]]  ;;  %v1190_v42 = vmul.f32 %v2876_v26, %v1189_v35 }
 0x131   : > { %s1198_s22 = smul.f32 %s3067_s19, %s2283_s24  ;;  %v1142_v38 = vmax.f32 %v1141_v29, 0.0  ;;  %s3107_s27 = sld [smem:[#allocation11 + $0x1d]]  ;;  %v1120_v43 = vadd.f32 %v1119_v28, %v1093_v20  ;;  %v1194_v45 = vmul.f32 %v2884_v27, %v1193_v36 }
 0x132   : > { %v1182_v39 = vstv %s1179_s12  ;;  %v1164_v40 = vadd.f32 %v1163_v24, %v1160_v32  ;;  %s1203_s11 = smul.f32 %s3081_s28, %s2290_s2  ;;  %s3112_s16 = sld [smem:[#allocation8 + $0x1d]] }
 0x133   : > { %v1183_v41 = vadd.f32 %v1182_v39, %v1181_v31  ;;  %v1146_v44 = vmul.f32 %v1145_v22, %v1142_v38  ;;  %s1205_s20 = smul.f32 %s3081_s28, %s2316_s6  ;;  %s3117_s30 = sld [smem:[#allocation8 + $0x9d]]  ;;  %v1212_v49 = vstv %s3089_s15  ;;  %v1199_v10 = vstv %s1198_s22 }
 0x134   : > { %v1168_v46 = vadd.f32 %v1167_v30, %v1164_v40  ;;  %v1207_v48 = vstv %s1203_s11  ;;  %s3120_s21 = sld [smem:[#allocation8 + $0x11d]]  ;;  %v1216_v52 = vstv %s3091_s29  ;;  %s3130_s0 = sld [smem:[#allocation10 + $0x1e]]  ;;  %v1213_v55 = vmul.f32 %v2904_v37, %v1212_v49 }
 0x135   : > { %v1187_v47 = vadd.f32 %v1186_v34, %v1183_v41  ;;  %s3122_s5 = sld [smem:[#allocation13 + $0x1d]]  ;;  %s1206_s26 = ssub.f32 %s3085_s1, %s1205_s20  ;;  %v1208_v51 = vmul.f32 %v2894_v33, %v1207_v48  ;;  %v1220_v56 = vstv %s3096_s14  ;;  %v1147_v57 = vadd.f32 %v1146_v44, %v1120_v43 }
 0x136   : > { %v1169_v53 = vmax.f32 %v1168_v46, 0.0  ;;  %s1225_s7 = smul.f32 %s3103_s3, %s2283_s24  ;;  %s3136_s28 = sld [smem:[#allocation11 + $0x1e]]  ;;  %v1217_v62 = vmul.f32 %v2876_v26, %v1216_v52  ;;  %v1221_v63 = vmul.f32 %v2884_v27, %v1220_v56 }
 0x137   : > { %v1191_v54 = vadd.f32 %v1190_v42, %v1187_v47  ;;  %v1209_v58 = vstv %s1206_s26  ;;  %s1230_s9 = smul.f32 %s3105_s23, %s2290_s2  ;;  %s3140_s17 = sld [smem:[#allocation8 + $0x1e]] }
 0x138   : > { %v1173_v59 = vmul.f32 %v1172_v50, %v1169_v53  ;;  %v1210_v61 = vadd.f32 %v1209_v58, %v1208_v51  ;;  %s1232_s4 = smul.f32 %s3105_s23, %s2316_s6  ;;  %s3145_s1 = sld [smem:[#allocation8 + $0x9e]]  ;;  %v1239_v3 = vstv %s3112_s16  ;;  %v1226_v15 = vstv %s1225_s7 }
 0x139   : > { %v1195_v60 = vadd.f32 %v1194_v45, %v1191_v54  ;;  %v1234_v1 = vstv %s1230_s9  ;;  %s3149_s15 = sld [smem:[#allocation8 + $0x11e]]  ;;  %v1243_v9 = vstv %s3117_s30  ;;  %v1240_v11 = vmul.f32 %v2904_v37, %v1239_v3  ;;  %s3163_s3 = sld [smem:[#allocation10 + $0x1f]] }
 0x13a   : > { %v1214_v6 = vadd.f32 %v1213_v55, %v1210_v61  ;;  %s1233_s29 = ssub.f32 %s3107_s27, %s1232_s4  ;;  %v1235_v8 = vmul.f32 %v2894_v33, %v1234_v1  ;;  %s3154_s12 = sld [smem:[#allocation13 + $0x1e]]  ;;  %v1247_v12 = vstv %s3120_s21  ;;  %v1174_v13 = vadd.f32 %v1173_v59, %v1147_v57 }
 0x13b   : > { %v1196_v4 = vmax.f32 %v1195_v60, 0.0  ;;  %s1257_s14 = smul.f32 %s3130_s0, %s2290_s2  ;;  %s3167_s27 = sld [smem:[#allocation11 + $0x1f]]  ;;  %v1244_v7 = vmul.f32 %v2876_v26, %v1243_v9  ;;  %v1248_v21 = vmul.f32 %v2884_v27, %v1247_v12 }
 0x13c   : > { %v1218_v14 = vadd.f32 %v1217_v62, %v1214_v6  ;;  %v1236_v16 = vstv %s1233_s29  ;;  %s1259_s23 = smul.f32 %s3130_s0, %s2316_s6  ;;  %s3171_s19 = sld [smem:[#allocation8 + $0x1f]] }
 0x13d   : > { %v1237_v5 = vadd.f32 %v1236_v16, %v1235_v8  ;;  %v1261_v17 = vstv %s1257_s14  ;;  %v1266_v18 = vstv %s3140_s17  ;;  %s3173_s22 = sld [smem:[#allocation8 + $0x9f]]  ;;  %v1200_v19 = vmul.f32 %v1199_v10, %v1196_v4  ;;  %s1252_s20 = smul.f32 %s3122_s5, %s2283_s24 }
 0x13e   : > { %v1222_v20 = vadd.f32 %v1221_v63, %v1218_v14  ;;  %s1260_s11 = ssub.f32 %s3136_s28, %s1259_s23  ;;  %v1262_v22 = vmul.f32 %v2894_v33, %v1261_v17  ;;  %s3178_s16 = sld [smem:[#allocation8 + $0x11f]]  ;;  %v1267_v0 = vmul.f32 %v2904_v37, %v1266_v18  ;;  %v1270_v24 = vstv %s3145_s1 }
 0x13f   : > { %v1241_v23 = vadd.f32 %v1240_v11, %v1237_v5  ;;  %v1274_v25 = vstv %s3149_s15  ;;  %v1271_v31 = vmul.f32 %v2876_v26, %v1270_v24  ;;  %s1284_s30 = smul.f32 %s3163_s3, %s2290_s2  ;;  %s3188_s21 = sld [smem:[#allocation13 + $0x1f]]  ;;  %v1201_v32 = vadd.f32 %v1200_v19, %v1174_v13 }
 0x140   : > { %v1223_v2 = vmax.f32 %v1222_v20, 0.0  ;;  %v1263_v28 = vstv %s1260_s11  ;;  %v1275_v35 = vmul.f32 %v2884_v27, %v1274_v25  ;;  %s1286_s26 = smul.f32 %s3163_s3, %s2316_s6  ;;  %s3193_s0 = sld [smem:[#allocation2]]  ;;  %v1253_v41 = vstv %s1252_s20 }
 0x141   : > { %v1245_v29 = vadd.f32 %v1244_v7, %v1241_v23  ;;  %v1264_v30 = vadd.f32 %v1263_v28, %v1262_v22  ;;  %v1288_v39 = vstv %s1284_s30  ;;  %s1279_s5 = smul.f32 %s3154_s12, %s2283_s24  ;;  %s1493_s28 = sshll.u32 %s2256_s13, 1 }
 0x142   : > { %v1227_v34 = vmul.f32 %v1226_v15, %v1223_v2  ;;  %v1293_v40 = vstv %s3171_s19  ;;  %s1287_s7 = ssub.f32 %s3167_s27, %s1286_s26  ;;  %v1289_v42 = vmul.f32 %v2894_v33, %v1288_v39  ;;  %s1687_s17 = sshll.u32 %s2003_s10, 5 }
 0x143   : > { %v1249_v36 = vadd.f32 %v1248_v21, %v1245_v29  ;;  %v1268_v38 = vadd.f32 %v1267_v0, %v1264_v30  ;;  %v1297_v43 = vstv %s3173_s22  ;;  %v1294_v46 = vmul.f32 %v2904_v37, %v1293_v40  ;;  %s426_s4 = scalar_lea.vmem [#allocation14], %s1493_s28  ;;  %s3215_s29 = scalar_lea.hbm %s3272_s8, %s1687_s17 }
 0x144   : > { %v1228_v47 = vadd.f32 %v1227_v34, %v1201_v32  ;;  %v1290_v48 = vstv %s1287_s7  ;;  %v1301_v49 = vstv %s3178_s16  ;;  %v1298_v53 = vmul.f32 %v2876_v26, %v1297_v43  ;;  %s1331_s1 = sshll.u32 %s426_s4, 4  ;;  %s2021_s10 = smov [#allocation14]   ;;  %s3217_s1 = int_to_ptr.vmem [resolvable:$true] %s1331_s1 }
 0x145   : > { %v1250_v44 = vmax.f32 %v1249_v36, 0.0  ;;  %v1272_v45 = vadd.f32 %v1271_v31, %v1268_v38  ;;  %v1291_v52 = vadd.f32 %v1290_v48, %v1289_v42  ;;  %v1280_v33 = vstv %s1279_s5  ;;  %s1306_s6 = smul.f32 %s3188_s21, %s2283_s24  ;;  %s1917_s12 = scalar_lea.vmem %s3217_s1, 32 }
 0x146   : > { %v1302_v56 = vmul.f32 %v2884_v27, %v1301_v49  ;;  %s1311_s2 = smul.f32 %s3193_s0, %s2283_s24  ;;  %p1918_p3 = scmp.ne.s32.totalorder %s3217_s1, %s1917_s12 }
 0x147   : > { %v1254_v50 = vmul.f32 %v1253_v41, %v1250_v44  ;;  %v1276_v51 = vadd.f32 %v1275_v35, %v1272_v45  ;;  %v1295_v55 = vadd.f32 %v1294_v46, %v1291_v52  ;;  %v1307_v60 = vstv %s1306_s6  ;;  %s1921_s14 = sshll.u32 %s2021_s10, 4  ;;  %s1922_s14 = int_to_ptr.vmem [resolvable:$false] %s1921_s14 }
 0x148   : > { %s1312_s9 = sadd.f32 %s1311_s2, %s2281_s18  ;;  %s1317_s18 = scalar_lea.sflag [#allocation5], %s2256_s13 }
 0x149   : > { %v1277_v54 = vmax.f32 %v1276_v51, 0.0  ;;  %v1255_v57 = vadd.f32 %v1254_v50, %v1228_v47  ;;  %v1299_v58 = vadd.f32 %v1298_v53, %v1295_v55  ;;  %p1919_p9 = pnand %p1918_p3, %p3319_p4  ;;  %s1923_s3 = scalar_lea.vmem %s1922_s14, 64 }
 0x14a   : > { %v1313_v63 = vstv %s1312_s9  ;;  %p1924_p0 = scmp.lt.s32.totalorder %s3217_s1, %s1922_s14  ;;  %p1925_p1 = scmp.lt.s32.totalorder %s1923_s3, %s1917_s12 }
 0x14b   : > { %v1281_v37 = vmul.f32 %v1280_v33, %v1277_v54  ;;  %v1303_v59 = vadd.f32 %v1302_v56, %v1299_v58  ;;  %p1920_p13 = pneg %p1919_p9 }
 0x14c   : > { %p1926_p8 = por %p1925_p1, %p1924_p0 }
 0x14d   : > { %v1282_v61 = vadd.f32 %v1281_v37, %v1255_v57  ;;  %v1304_v62 = vmax.f32 %v1303_v59, 0.0 }
 0x14e   : > { %p1927_p7 = pnand %p1926_p8, %p1920_p13 }
 0x14f   : > { %v1308_v26 = vmul.f32 %v1307_v60, %v1304_v62 }
 0x151   : > { %v1309_v1 = vadd.f32 %v1308_v26, %v1282_v61 }
 0x153   : > { %v1314_v27 = vadd.f32 %v1313_v63, %v1309_v1 }
 0x155   : > { %1315 = vst [vmem:[%s426_s4] sm:$0x3] %v1314_v27 }
 0x156   : > { %1930 = shalt.err (!%p1927_p7)
}
 0x157   : > { %s1931_s13 = scalar_lea.hbm %s3215_s29, 32  ;;  %s1935_s19 = scalar_lea.hbm %s3272_s8, 64 }
 0x158   : > { %p1932_p10 = scmp.ne.s32.totalorder %s3215_s29, %s1931_s13  ;;  %p1936_p5 = scmp.lt.u32.totalorder %s3215_s29, %s3272_s8 }
 0x159   : > { %p1937_p2 = scmp.lt.u32.totalorder %s1935_s19, %s1931_s13  ;;  %p1939_p3 = scmp.lt.u32.totalorder %s1931_s13, %s3215_s29 }
 0x15a   : > { %p1933_p11 = pnand %p1932_p10, %p3319_p4 }
 0x15b   : > { %p1938_p6 = por %p1937_p2, %p1936_p5 }
 0x15c   : > { %p1934_p12 = pneg %p1933_p11 }
 0x15d   : > { %p1940_p9 = por %p1939_p3, %p1938_p6 }
 0x15f   : > { %p1941_p13 = pnand %p1940_p9, %p1934_p12 }
 0x161   : > { %1944 = shalt.err (!%p1941_p13)
}
 0x162   : > { %1715 = dma.vmem_to_hbm [thread:$0]  (%p3319_p4), %s3217_s1, 32, %s3215_s29, %s1317_s18  }
 0x163 PF: > { %s3320_s16 = sld [smem:[#allocation20_spill]]  ;;  %s3321_s20 = sld [smem:[#allocation27_spill]] }
 0x164   : > { %s3322_s30 = sld [smem:[#allocation24_spill]] }
 0x169   : > { %s1343_s21 = sand.u32 1, %s3320_s16   ;;  %p3323_p0 = scmp.ne.s32.totalorder %s3321_s20, 0 }
 0x16a   : > { %p3324_p1 = scmp.ge.s32.totalorder %s3322_s30, 2  ;;  %s1344_s26 = scalar_lea.sflag [#allocation5], %s1343_s21 }
 0x16c   : > { %p1738_p8 = pnand %p3324_p1, %p3323_p0 }
 0x16e   : > { %1986 = dma.done.wait (!%p1738_p8), %s1344_s26, 32  }
 0x16f   : > { %1988 = vsyncadd (!%p1738_p8), %s1344_s26, 4294967264  ;;  %s28_s12 = sadd.s32 1, %s3322_s30   ;;  %s3325_s29 = sld [smem:[#allocation21_spill]] }
 0x170   : > { %p25_p7 = scmp.ge.s32.totalorder %s28_s12, 4   ;;  %s3326_s30 = sld [smem:[#allocation22_spill]] }
 0x171   : > { %s3327_s9 = sld [smem:[#allocation26_spill]]  ;;  %s3328_s10 = sld [smem:[#allocation23_spill]] }
 0x172   : > { %s3329_s11 = sld [smem:[#allocation25_spill]]  ;;  %27 = sbr.rel (!%p25_p7) target bundleno = 18 (0x12), region = 123 }
 0x179   :  { %1349 = vsyncpa [#allocation4], 1 }
 0x17a   :  { %1351 = vsyncpa [#allocation4 + $0x1], 1 }
 0x17b   :  { %1352 = vsyncpa [#allocation5], 1 }
 0x17c   :  { %1354 = vsyncpa [#allocation5 + $0x1], 1 }
 0x17d   :  { %1355 = vsyncpa [#allocation6], 1 }
 0x17e   :  { %1357 = vsyncpa [#allocation6 + $0x1], 1 }
 0x17f   :  { %1358 = vsyncpa [#allocation9], 1 }
 0x180   :  { %1359 = vsyncpa [#allocation12], 1 }

</bundles_post_ra>
